<compile_context>
chip_gen: v5e
topology: v5e:2x2
jax: 0.10.0
libtpu: 0.0.40
codegen_flags: <defaults>
</compile_context>

<pallas_src>
import math
import functools

import jax
import jax.numpy as jnp
from jax.experimental import pallas as pl
from jax.experimental.pallas import tpu as pltpu


# ------------------------------ fused kernel ------------------------------

def _head_kernel(tok_ref, bias_ref, wp_ref, bp_ref, g0_ref, b0_ref,
                 wqkv_ref, bqkv_ref, wo_ref, bo_ref,
                 w1_ref, b1_ref, w2_ref, b2_ref,
                 n1g_ref, n1b_ref, n2g_ref, n2b_ref,
                 o_ref, h_sc, *, nhead, eps=1e-5):
    """grid = (batch b, layer l).  h_sc (S, D) f32 holds the residual stream
    for the current batch image across the layer axis."""
    D = o_ref.shape[-1]
    hd = D // nhead
    l = pl.program_id(1)

    def ln(x, g, b):
        mu = jnp.mean(x, axis=-1, keepdims=True)
        var = jnp.mean(jnp.square(x - mu), axis=-1, keepdims=True)
        return (x - mu) * jax.lax.rsqrt(var + eps) * g + b

    # ---- layer 0: input projection + post-proj LayerNorm (once per image) ----
    @pl.when(l == 0)
    def _():
        x = tok_ref[...].astype(jnp.bfloat16)                        # (S, Cin)
        h0 = jnp.dot(x, wp_ref[...],
                     preferred_element_type=jnp.float32) + bp_ref[...]
        h_sc[...] = ln(h0, g0_ref[...], b0_ref[...])

    h = h_sc[...]                                                    # (S, D) f32
    hb = h.astype(jnp.bfloat16)

    # ---- self-attention (q = k = v = src, pos embedding is None) ----
    qkv = jnp.dot(hb, wqkv_ref[0],
                  preferred_element_type=jnp.float32) + bqkv_ref[0]  # (S, 3D) f32
    q = qkv[:, :D] * (1.0 / math.sqrt(hd))        # scale q, not the score tensor
    k = qkv[:, D:2 * D]
    v = qkv[:, 2 * D:]
    qb = q.astype(jnp.bfloat16)
    kb = k.astype(jnp.bfloat16)
    vb = v.astype(jnp.bfloat16)
    bias = bias_ref[0]                            # (S, S) f32 key-padding bias
    # NOTE: with the finite -1e30 bias a fully-masked row degrades to a uniform
    # softmax instead of NaN (the torch module would NaN in that case).

    heads = []
    for hh in range(nhead):                       # static unrolled head loop
        sl = slice(hh * hd, (hh + 1) * hd)
        s = jax.lax.dot_general(qb[:, sl], kb[:, sl],
                                (((1,), (1,)), ((), ())),
                                preferred_element_type=jnp.float32)  # (S, S)
        s = s + bias                              # bias add / softmax in f32
        m = jnp.max(s, axis=-1, keepdims=True)
        p = jnp.exp(s - m)
        p = p * pl.reciprocal(jnp.sum(p, axis=-1, keepdims=True), approx=True)
        heads.append(jnp.dot(p.astype(jnp.bfloat16), vb[:, sl],
                             preferred_element_type=jnp.float32))    # (S, hd)
    attn = jnp.concatenate(heads, axis=-1)                           # (S, D)
    attn = jnp.dot(attn.astype(jnp.bfloat16), wo_ref[0],
                   preferred_element_type=jnp.float32) + bo_ref[0]
    h = ln(h + attn, n1g_ref[0], n1b_ref[0])      # dropout = identity (eval)

    # ---- feed-forward ----
    ff = jnp.dot(h.astype(jnp.bfloat16), w1_ref[0],
                 preferred_element_type=jnp.float32) + b1_ref[0]
    ff = jnp.maximum(ff, 0.0)                     # relu
    ff = jnp.dot(ff.astype(jnp.bfloat16), w2_ref[0],
                 preferred_element_type=jnp.float32) + b2_ref[0]
    h = ln(h + ff, n2g_ref[0], n2b_ref[0])

    h_sc[...] = h

    @pl.when(l == pl.num_programs(1) - 1)
    def _():
        o_ref[...] = h_sc[...].astype(o_ref.dtype)


# ------------------------------ forward wrapper ------------------------------

def head_forward(params, x, dec_mask):
    """x: (B, S, C, H, W); dec_mask: (B, S) bool, True = padded proposal.
    Returns (B*S, d_model), row order == torch .transpose(0,1).view(B*S, D)."""
    B, S, C, H, W = x.shape
    Cin = C * H * W
    D = params["d_model"]
    F = params["dff"]
    L = params["num_layers"]
    nhead = params["nhead"]

    tokens = x.reshape(B * S, Cin)                      # == torch flatten(2)
    bias = jnp.where(dec_mask, -1e30, 0.0).astype(jnp.float32)
    bias = jnp.broadcast_to(bias[:, None, :], (B, S, S))  # additive, per-query rows

    def resident2(shape):                               # whole array, stays in VMEM
        return pl.BlockSpec(shape, lambda b, l: (0, 0))

    def per_layer(shape):                               # streamed along layer axis
        return pl.BlockSpec((1,) + shape, lambda b, l: (l, 0, 0))

    grid_spec = pltpu.PrefetchScalarGridSpec(
        num_scalar_prefetch=0,
        grid=(B, L),
        in_specs=[
            pl.BlockSpec((S, Cin), lambda b, l: (b, 0)),      # tokens
            pl.BlockSpec((1, S, S), lambda b, l: (b, 0, 0)),  # key-padding bias
            resident2((Cin, D)), resident2((1, D)),           # input proj
            resident2((1, D)), resident2((1, D)),             # post-proj LN
            per_layer((D, 3 * D)), per_layer((1, 3 * D)),     # in_proj
            per_layer((D, D)), per_layer((1, D)),             # out_proj
            per_layer((D, F)), per_layer((1, F)),             # linear1
            per_layer((F, D)), per_layer((1, D)),             # linear2
            per_layer((1, D)), per_layer((1, D)),             # norm1
            per_layer((1, D)), per_layer((1, D)),             # norm2
        ],
        out_specs=pl.BlockSpec((S, D), lambda b, l: (b, 0)),
        scratch_shapes=[pltpu.VMEM((S, D), jnp.float32)],
    )

    return pl.pallas_call(
        functools.partial(_head_kernel, nhead=nhead),
        out_shape=jax.ShapeDtypeStruct((B * S, D), jnp.float32),
        grid_spec=grid_spec,
        compiler_params=pltpu.CompilerParams(
            dimension_semantics=("parallel", "arbitrary")),
    )(tokens, bias,
      params["input_proj_w"], params["input_proj_b"],
      params["ln0_g"], params["ln0_b"],
      params["in_proj_w"], params["in_proj_b"],
      params["out_proj_w"], params["out_proj_b"],
      params["linear1_w"], params["linear1_b"],
      params["linear2_w"], params["linear2_b"],
      params["norm1_g"], params["norm1_b"],
      params["norm2_g"], params["norm2_b"])


# ------------------------------ parameter setup ------------------------------

def _xavier(key, fan_out, fan_in):
    limit = math.sqrt(6.0 / (fan_in + fan_out))
    return jax.random.uniform(key, (fan_out, fan_in), jnp.float32, -limit, limit)


def make_params(key, total_channels, d_model, nhead, num_layers, dff):
    """Weights pre-transposed to (Din, Dout) and stored bf16 for the MXU;
    biases / LayerNorm params stay f32 (VPU math stays f32)."""
    D, F, L = d_model, dff, num_layers
    keys = jax.random.split(key, 1 + 4 * L)
    ki = iter(keys)

    params = {
        "d_model": D, "nhead": nhead, "num_layers": L, "dff": F,
        "input_proj_w": _xavier(next(ki), D, total_channels).T.astype(jnp.bfloat16),
        "input_proj_b": jnp.zeros((1, D), jnp.float32),
        "ln0_g": jnp.ones((1, D), jnp.float32),
        "ln0_b": jnp.zeros((1, D), jnp.float32),
    }
    in_w, out_w, l1_w, l2_w = [], [], [], []
    for _ in range(L):
        in_w.append(_xavier(next(ki), 3 * D, D).T)   # torch (3D, D) -> (D, 3D)
        out_w.append(_xavier(next(ki), D, D).T)
        l1_w.append(_xavier(next(ki), F, D).T)       # torch (F, D) -> (D, F)
        l2_w.append(_xavier(next(ki), D, F).T)       # torch (D, F) -> (F, D)
    params["in_proj_w"] = jnp.stack(in_w).astype(jnp.bfloat16)      # (L, D, 3D)
    params["in_proj_b"] = jnp.zeros((L, 1, 3 * D), jnp.float32)
    params["out_proj_w"] = jnp.stack(out_w).astype(jnp.bfloat16)    # (L, D, D)
    params["out_proj_b"] = jnp.zeros((L, 1, D), jnp.float32)
    params["linear1_w"] = jnp.stack(l1_w).astype(jnp.bfloat16)      # (L, D, F)
    params["linear1_b"] = jnp.zeros((L, 1, F), jnp.float32)
    params["linear2_w"] = jnp.stack(l2_w).astype(jnp.bfloat16)      # (L, F, D)
    params["linear2_b"] = jnp.zeros((L, 1, D), jnp.float32)
    params["norm1_g"] = jnp.ones((L, 1, D), jnp.float32)
    params["norm1_b"] = jnp.zeros((L, 1, D), jnp.float32)
    params["norm2_g"] = jnp.ones((L, 1, D), jnp.float32)
    params["norm2_b"] = jnp.zeros((L, 1, D), jnp.float32)
    return params


# ----------------------------------- main -----------------------------------

if __name__ == "__main__":
    # Small, lane-dense shapes consistent with the module's forward.
    B, S, C, H, W = 2, 8, 4, 4, 4           # (batch, proposals, channels, h, w)
    d_model, nhead, num_layers, dff = 128, 4, 2, 256

    key = jax.random.PRNGKey(0)
    kp, kx = jax.random.split(key)
    params = make_params(kp, C * H * W, d_model, nhead, num_layers, dff)

    x = jax.random.normal(kx, (B, S, C, H, W), jnp.float32)
    # key-padding mask: last two proposals per image are padding (never all-True)
    dec_mask = jnp.zeros((B, S), dtype=bool).at[:, S - 2:].set(True)

    out = head_forward(params, x, dec_mask)
    out = jax.block_until_ready(out)
    assert out.shape == (B * S, d_model)
    assert bool(jnp.all(jnp.isfinite(out)))
    print("KERNEL_OK")
</pallas_src>

<mosaic_0001>
module attributes {stable_mosaic.version = 11 : i64} {
  func.func @_head_kernel(%arg0: i32, %arg1: i32, %arg2: memref<8x64xf32, #tpu.memory_space<vmem>>, %arg3: memref<1x8x8xf32, #tpu.memory_space<vmem>>, %arg4: memref<64x128xbf16, #tpu.memory_space<vmem>>, %arg5: memref<1x128xf32, #tpu.memory_space<vmem>>, %arg6: memref<1x128xf32, #tpu.memory_space<vmem>>, %arg7: memref<1x128xf32, #tpu.memory_space<vmem>>, %arg8: memref<1x128x384xbf16, #tpu.memory_space<vmem>>, %arg9: memref<1x1x384xf32, #tpu.memory_space<vmem>>, %arg10: memref<1x128x128xbf16, #tpu.memory_space<vmem>>, %arg11: memref<1x1x128xf32, #tpu.memory_space<vmem>>, %arg12: memref<1x128x256xbf16, #tpu.memory_space<vmem>>, %arg13: memref<1x1x256xf32, #tpu.memory_space<vmem>>, %arg14: memref<1x256x128xbf16, #tpu.memory_space<vmem>>, %arg15: memref<1x1x128xf32, #tpu.memory_space<vmem>>, %arg16: memref<1x1x128xf32, #tpu.memory_space<vmem>>, %arg17: memref<1x1x128xf32, #tpu.memory_space<vmem>>, %arg18: memref<1x1x128xf32, #tpu.memory_space<vmem>>, %arg19: memref<1x1x128xf32, #tpu.memory_space<vmem>>, %arg20: memref<8x128xf32, #tpu.memory_space<vmem>>, %arg21: memref<8x128xf32, #tpu.memory_space<vmem>>) attributes {dimension_semantics = [#tpu.dimension_semantics<parallel>, #tpu.dimension_semantics<arbitrary>], iteration_bounds = array<i64: 2, 2>, scalar_prefetch = 0 : i64, scratch_operands = 1 : i64, tpu.core_type = #tpu.core_type<tc>, window_params = [{transform_indices = @transform_0, window_bounds = array<i64: 8, 64>}, {transform_indices = @transform_1, window_bounds = array<i64: 1, 8, 8>}, {pipeline_mode = #tpu.pipeline_mode<synchronous>, transform_indices = @transform_2, window_bounds = array<i64: 64, 128>}, {pipeline_mode = #tpu.pipeline_mode<synchronous>, transform_indices = @transform_3, window_bounds = array<i64: 1, 128>}, {pipeline_mode = #tpu.pipeline_mode<synchronous>, transform_indices = @transform_4, window_bounds = array<i64: 1, 128>}, {pipeline_mode = #tpu.pipeline_mode<synchronous>, transform_indices = @transform_5, window_bounds = array<i64: 1, 128>}, {transform_indices = @transform_6, window_bounds = array<i64: 1, 128, 384>}, {transform_indices = @transform_7, window_bounds = array<i64: 1, 1, 384>}, {transform_indices = @transform_8, window_bounds = array<i64: 1, 128, 128>}, {transform_indices = @transform_9, window_bounds = array<i64: 1, 1, 128>}, {transform_indices = @transform_10, window_bounds = array<i64: 1, 128, 256>}, {transform_indices = @transform_11, window_bounds = array<i64: 1, 1, 256>}, {transform_indices = @transform_12, window_bounds = array<i64: 1, 256, 128>}, {transform_indices = @transform_13, window_bounds = array<i64: 1, 1, 128>}, {transform_indices = @transform_14, window_bounds = array<i64: 1, 1, 128>}, {transform_indices = @transform_15, window_bounds = array<i64: 1, 1, 128>}, {transform_indices = @transform_16, window_bounds = array<i64: 1, 1, 128>}, {transform_indices = @transform_17, window_bounds = array<i64: 1, 1, 128>}, {transform_indices = @transform_18, window_bounds = array<i64: 8, 128>}]} {
    %c0_i32 = arith.constant 0 : i32
    %0 = arith.cmpi eq, %arg1, %c0_i32 : i32
    %1 = arith.extui %0 : i1 to i32
    %c0_i32_0 = arith.constant 0 : i32
    %2 = arith.cmpi ne, %1, %c0_i32_0 : i32
    scf.if %2 {
      %c0_75 = arith.constant 0 : index
      %c0_76 = arith.constant 0 : index
      %175 = vector.load %arg2[%c0_75, %c0_76] : memref<8x64xf32, #tpu.memory_space<vmem>>, vector<8x64xf32>
      %176 = arith.truncf %175 : vector<8x64xf32> to vector<8x64xbf16>
      %c0_77 = arith.constant 0 : index
      %c0_78 = arith.constant 0 : index
      %177 = vector.load %arg4[%c0_77, %c0_78] : memref<64x128xbf16, #tpu.memory_space<vmem>>, vector<64x128xbf16>
      %cst_79 = arith.constant dense<0.000000e+00> : vector<8x128xf32>
      %178 = tpu.matmul %176, %177, %cst_79 {dimension_numbers = #tpu.dot_dimension_numbers<[1], [0], [0], [1], [0, 0, 1, 1], [], []>} : vector<8x64xbf16>, vector<64x128xbf16>, vector<8x128xf32> -> vector<8x128xf32>
      %c0_80 = arith.constant 0 : index
      %c0_81 = arith.constant 0 : index
      %179 = vector.load %arg5[%c0_80, %c0_81] : memref<1x128xf32, #tpu.memory_space<vmem>>, vector<1x128xf32>
      %180 = vector.broadcast %179 : vector<1x128xf32> to vector<8x128xf32>
      %181 = arith.addf %178, %180 : vector<8x128xf32>
      %c0_82 = arith.constant 0 : index
      %c0_83 = arith.constant 0 : index
      %182 = vector.load %arg6[%c0_82, %c0_83] : memref<1x128xf32, #tpu.memory_space<vmem>>, vector<1x128xf32>
      %c0_84 = arith.constant 0 : index
      %c0_85 = arith.constant 0 : index
      %183 = vector.load %arg7[%c0_84, %c0_85] : memref<1x128xf32, #tpu.memory_space<vmem>>, vector<1x128xf32>
      %cst_86 = arith.constant dense<0.000000e+00> : vector<8xf32>
      %184 = vector.multi_reduction <add>, %181, %cst_86 [1] : vector<8x128xf32> to vector<8xf32>
      %185 = vector.shape_cast %184 : vector<8xf32> to vector<8x1xf32>
      %cst_87 = arith.constant 1.280000e+02 : f32
      %186 = vector.broadcast %cst_87 : f32 to vector<8x1xf32>
      %187 = arith.divf %185, %186 : vector<8x1xf32>
      %188 = vector.broadcast %187 : vector<8x1xf32> to vector<8x128xf32>
      %189 = arith.subf %181, %188 : vector<8x128xf32>
      %190 = arith.mulf %189, %189 : vector<8x128xf32>
      %cst_88 = arith.constant dense<0.000000e+00> : vector<8xf32>
      %191 = vector.multi_reduction <add>, %190, %cst_88 [1] : vector<8x128xf32> to vector<8xf32>
      %192 = vector.shape_cast %191 : vector<8xf32> to vector<8x1xf32>
      %cst_89 = arith.constant 1.280000e+02 : f32
      %193 = vector.broadcast %cst_89 : f32 to vector<8x1xf32>
      %194 = arith.divf %192, %193 : vector<8x1xf32>
      %195 = vector.broadcast %187 : vector<8x1xf32> to vector<8x128xf32>
      %196 = arith.subf %181, %195 : vector<8x128xf32>
      %cst_90 = arith.constant 9.99999974E-6 : f32
      %197 = vector.broadcast %cst_90 : f32 to vector<8x1xf32>
      %198 = arith.addf %194, %197 : vector<8x1xf32>
      %199 = math.rsqrt %198 : vector<8x1xf32>
      %200 = vector.broadcast %199 : vector<8x1xf32> to vector<8x128xf32>
      %201 = arith.mulf %196, %200 : vector<8x128xf32>
      %202 = vector.broadcast %182 : vector<1x128xf32> to vector<8x128xf32>
      %203 = arith.mulf %201, %202 : vector<8x128xf32>
      %204 = vector.broadcast %183 : vector<1x128xf32> to vector<8x128xf32>
      %205 = arith.addf %203, %204 : vector<8x128xf32>
      %c0_91 = arith.constant 0 : index
      %c0_92 = arith.constant 0 : index
      %206 = vector.load %arg21[%c0_91, %c0_92] : memref<8x128xf32, #tpu.memory_space<vmem>>, vector<8x128xf32>
      tpu.vector_store %arg21[%c0_91, %c0_92], %205 {strides = array<i32>} : memref<8x128xf32, #tpu.memory_space<vmem>>, vector<8x128xf32>,
    } else {
    }
    %c0 = arith.constant 0 : index
    %c0_1 = arith.constant 0 : index
    %3 = vector.load %arg21[%c0, %c0_1] : memref<8x128xf32, #tpu.memory_space<vmem>>, vector<8x128xf32>
    %4 = arith.truncf %3 : vector<8x128xf32> to vector<8x128xbf16>
    %c0_2 = arith.constant 0 : index
    %c0_3 = arith.constant 0 : index
    %c0_4 = arith.constant 0 : index
    %5 = vector.load %arg8[%c0_2, %c0_3, %c0_4] : memref<1x128x384xbf16, #tpu.memory_space<vmem>>, vector<1x128x384xbf16>
    %6 = vector.shape_cast %5 : vector<1x128x384xbf16> to vector<128x384xbf16>
    %cst = arith.constant dense<0.000000e+00> : vector<8x384xf32>
    %7 = tpu.matmul %4, %6, %cst {dimension_numbers = #tpu.dot_dimension_numbers<[1], [0], [0], [1], [0, 0, 1, 1], [], []>} : vector<8x128xbf16>, vector<128x384xbf16>, vector<8x384xf32> -> vector<8x384xf32>
    %c0_5 = arith.constant 0 : index
    %c0_6 = arith.constant 0 : index
    %c0_7 = arith.constant 0 : index
    %8 = vector.load %arg9[%c0_5, %c0_6, %c0_7] : memref<1x1x384xf32, #tpu.memory_space<vmem>>, vector<1x1x384xf32>
    %9 = vector.shape_cast %8 : vector<1x1x384xf32> to vector<1x384xf32>
    %10 = vector.broadcast %9 : vector<1x384xf32> to vector<8x384xf32>
    %11 = arith.addf %7, %10 : vector<8x384xf32>
    %12 = vector.extract_strided_slice %11 {offsets = [0, 0], sizes = [8, 128], strides = [1, 1]} : vector<8x384xf32> to vector<8x128xf32>
    %cst_8 = arith.constant 0.176776692 : f32
    %13 = vector.broadcast %cst_8 : f32 to vector<8x128xf32>
    %14 = arith.mulf %12, %13 : vector<8x128xf32>
    %15 = vector.extract_strided_slice %11 {offsets = [0, 128], sizes = [8, 128], strides = [1, 1]} : vector<8x384xf32> to vector<8x128xf32>
    %16 = vector.extract_strided_slice %11 {offsets = [0, 256], sizes = [8, 128], strides = [1, 1]} : vector<8x384xf32> to vector<8x128xf32>
    %17 = arith.truncf %14 : vector<8x128xf32> to vector<8x128xbf16>
    %18 = arith.truncf %15 : vector<8x128xf32> to vector<8x128xbf16>
    %19 = arith.truncf %16 : vector<8x128xf32> to vector<8x128xbf16>
    %c0_9 = arith.constant 0 : index
    %c0_10 = arith.constant 0 : index
    %c0_11 = arith.constant 0 : index
    %20 = vector.load %arg3[%c0_9, %c0_10, %c0_11] : memref<1x8x8xf32, #tpu.memory_space<vmem>>, vector<1x8x8xf32>
    %21 = vector.shape_cast %20 : vector<1x8x8xf32> to vector<8x8xf32>
    %22 = vector.extract_strided_slice %17 {offsets = [0, 0], sizes = [8, 32], strides = [1, 1]} : vector<8x128xbf16> to vector<8x32xbf16>
    %23 = vector.extract_strided_slice %18 {offsets = [0, 0], sizes = [8, 32], strides = [1, 1]} : vector<8x128xbf16> to vector<8x32xbf16>
    %cst_12 = arith.constant dense<0.000000e+00> : vector<8x8xf32>
    %24 = tpu.matmul %22, %23, %cst_12 {dimension_numbers = #tpu.dot_dimension_numbers<[1], [1], [0], [0], [0, 0, 1, 0], [], []>} : vector<8x32xbf16>, vector<8x32xbf16>, vector<8x8xf32> -> vector<8x8xf32>
    %25 = arith.addf %24, %21 : vector<8x8xf32>
    %cst_13 = arith.constant dense<0xFF800000> : vector<8xf32>
    %26 = vector.multi_reduction <maximumf>, %25, %cst_13 [1] : vector<8x8xf32> to vector<8xf32>
    %27 = vector.shape_cast %26 : vector<8xf32> to vector<8x1xf32>
    %28 = vector.broadcast %27 : vector<8x1xf32> to vector<8x8xf32>
    %29 = arith.subf %25, %28 : vector<8x8xf32>
    %30 = math.exp %29 : vector<8x8xf32>
    %cst_14 = arith.constant dense<0.000000e+00> : vector<8xf32>
    %31 = vector.multi_reduction <add>, %30, %cst_14 [1] : vector<8x8xf32> to vector<8xf32>
    %32 = vector.shape_cast %31 : vector<8xf32> to vector<8x1xf32>
    %33 = tpu.reciprocal %32 {approx = true} : vector<8x1xf32> -> vector<8x1xf32>
    %34 = vector.broadcast %33 : vector<8x1xf32> to vector<8x8xf32>
    %35 = arith.mulf %30, %34 : vector<8x8xf32>
    %36 = arith.truncf %35 : vector<8x8xf32> to vector<8x8xbf16>
    %37 = vector.extract_strided_slice %19 {offsets = [0, 0], sizes = [8, 32], strides = [1, 1]} : vector<8x128xbf16> to vector<8x32xbf16>
    %cst_15 = arith.constant dense<0.000000e+00> : vector<8x32xf32>
    %38 = tpu.matmul %36, %37, %cst_15 {dimension_numbers = #tpu.dot_dimension_numbers<[1], [0], [0], [1], [0, 0, 1, 1], [], []>} : vector<8x8xbf16>, vector<8x32xbf16>, vector<8x32xf32> -> vector<8x32xf32>
    %39 = vector.extract_strided_slice %17 {offsets = [0, 32], sizes = [8, 32], strides = [1, 1]} : vector<8x128xbf16> to vector<8x32xbf16>
    %40 = vector.extract_strided_slice %18 {offsets = [0, 32], sizes = [8, 32], strides = [1, 1]} : vector<8x128xbf16> to vector<8x32xbf16>
    %cst_16 = arith.constant dense<0.000000e+00> : vector<8x8xf32>
    %41 = tpu.matmul %39, %40, %cst_16 {dimension_numbers = #tpu.dot_dimension_numbers<[1], [1], [0], [0], [0, 0, 1, 0], [], []>} : vector<8x32xbf16>, vector<8x32xbf16>, vector<8x8xf32> -> vector<8x8xf32>
    %42 = arith.addf %41, %21 : vector<8x8xf32>
    %cst_17 = arith.constant dense<0xFF800000> : vector<8xf32>
    %43 = vector.multi_reduction <maximumf>, %42, %cst_17 [1] : vector<8x8xf32> to vector<8xf32>
    %44 = vector.shape_cast %43 : vector<8xf32> to vector<8x1xf32>
    %45 = vector.broadcast %44 : vector<8x1xf32> to vector<8x8xf32>
    %46 = arith.subf %42, %45 : vector<8x8xf32>
    %47 = math.exp %46 : vector<8x8xf32>
    %cst_18 = arith.constant dense<0.000000e+00> : vector<8xf32>
    %48 = vector.multi_reduction <add>, %47, %cst_18 [1] : vector<8x8xf32> to vector<8xf32>
    %49 = vector.shape_cast %48 : vector<8xf32> to vector<8x1xf32>
    %50 = tpu.reciprocal %49 {approx = true} : vector<8x1xf32> -> vector<8x1xf32>
    %51 = vector.broadcast %50 : vector<8x1xf32> to vector<8x8xf32>
    %52 = arith.mulf %47, %51 : vector<8x8xf32>
    %53 = arith.truncf %52 : vector<8x8xf32> to vector<8x8xbf16>
    %54 = vector.extract_strided_slice %19 {offsets = [0, 32], sizes = [8, 32], strides = [1, 1]} : vector<8x128xbf16> to vector<8x32xbf16>
    %cst_19 = arith.constant dense<0.000000e+00> : vector<8x32xf32>
    %55 = tpu.matmul %53, %54, %cst_19 {dimension_numbers = #tpu.dot_dimension_numbers<[1], [0], [0], [1], [0, 0, 1, 1], [], []>} : vector<8x8xbf16>, vector<8x32xbf16>, vector<8x32xf32> -> vector<8x32xf32>
    %56 = vector.extract_strided_slice %17 {offsets = [0, 64], sizes = [8, 32], strides = [1, 1]} : vector<8x128xbf16> to vector<8x32xbf16>
    %57 = vector.extract_strided_slice %18 {offsets = [0, 64], sizes = [8, 32], strides = [1, 1]} : vector<8x128xbf16> to vector<8x32xbf16>
    %cst_20 = arith.constant dense<0.000000e+00> : vector<8x8xf32>
    %58 = tpu.matmul %56, %57, %cst_20 {dimension_numbers = #tpu.dot_dimension_numbers<[1], [1], [0], [0], [0, 0, 1, 0], [], []>} : vector<8x32xbf16>, vector<8x32xbf16>, vector<8x8xf32> -> vector<8x8xf32>
    %59 = arith.addf %58, %21 : vector<8x8xf32>
    %cst_21 = arith.constant dense<0xFF800000> : vector<8xf32>
    %60 = vector.multi_reduction <maximumf>, %59, %cst_21 [1] : vector<8x8xf32> to vector<8xf32>
    %61 = vector.shape_cast %60 : vector<8xf32> to vector<8x1xf32>
    %62 = vector.broadcast %61 : vector<8x1xf32> to vector<8x8xf32>
    %63 = arith.subf %59, %62 : vector<8x8xf32>
    %64 = math.exp %63 : vector<8x8xf32>
    %cst_22 = arith.constant dense<0.000000e+00> : vector<8xf32>
    %65 = vector.multi_reduction <add>, %64, %cst_22 [1] : vector<8x8xf32> to vector<8xf32>
    %66 = vector.shape_cast %65 : vector<8xf32> to vector<8x1xf32>
    %67 = tpu.reciprocal %66 {approx = true} : vector<8x1xf32> -> vector<8x1xf32>
    %68 = vector.broadcast %67 : vector<8x1xf32> to vector<8x8xf32>
    %69 = arith.mulf %64, %68 : vector<8x8xf32>
    %70 = arith.truncf %69 : vector<8x8xf32> to vector<8x8xbf16>
    %71 = vector.extract_strided_slice %19 {offsets = [0, 64], sizes = [8, 32], strides = [1, 1]} : vector<8x128xbf16> to vector<8x32xbf16>
    %cst_23 = arith.constant dense<0.000000e+00> : vector<8x32xf32>
    %72 = tpu.matmul %70, %71, %cst_23 {dimension_numbers = #tpu.dot_dimension_numbers<[1], [0], [0], [1], [0, 0, 1, 1], [], []>} : vector<8x8xbf16>, vector<8x32xbf16>, vector<8x32xf32> -> vector<8x32xf32>
    %73 = vector.extract_strided_slice %17 {offsets = [0, 96], sizes = [8, 32], strides = [1, 1]} : vector<8x128xbf16> to vector<8x32xbf16>
    %74 = vector.extract_strided_slice %18 {offsets = [0, 96], sizes = [8, 32], strides = [1, 1]} : vector<8x128xbf16> to vector<8x32xbf16>
    %cst_24 = arith.constant dense<0.000000e+00> : vector<8x8xf32>
    %75 = tpu.matmul %73, %74, %cst_24 {dimension_numbers = #tpu.dot_dimension_numbers<[1], [1], [0], [0], [0, 0, 1, 0], [], []>} : vector<8x32xbf16>, vector<8x32xbf16>, vector<8x8xf32> -> vector<8x8xf32>
    %76 = arith.addf %75, %21 : vector<8x8xf32>
    %cst_25 = arith.constant dense<0xFF800000> : vector<8xf32>
    %77 = vector.multi_reduction <maximumf>, %76, %cst_25 [1] : vector<8x8xf32> to vector<8xf32>
    %78 = vector.shape_cast %77 : vector<8xf32> to vector<8x1xf32>
    %79 = vector.broadcast %78 : vector<8x1xf32> to vector<8x8xf32>
    %80 = arith.subf %76, %79 : vector<8x8xf32>
    %81 = math.exp %80 : vector<8x8xf32>
    %cst_26 = arith.constant dense<0.000000e+00> : vector<8xf32>
    %82 = vector.multi_reduction <add>, %81, %cst_26 [1] : vector<8x8xf32> to vector<8xf32>
    %83 = vector.shape_cast %82 : vector<8xf32> to vector<8x1xf32>
    %84 = tpu.reciprocal %83 {approx = true} : vector<8x1xf32> -> vector<8x1xf32>
    %85 = vector.broadcast %84 : vector<8x1xf32> to vector<8x8xf32>
    %86 = arith.mulf %81, %85 : vector<8x8xf32>
    %87 = arith.truncf %86 : vector<8x8xf32> to vector<8x8xbf16>
    %88 = vector.extract_strided_slice %19 {offsets = [0, 96], sizes = [8, 32], strides = [1, 1]} : vector<8x128xbf16> to vector<8x32xbf16>
    %cst_27 = arith.constant dense<0.000000e+00> : vector<8x32xf32>
    %89 = tpu.matmul %87, %88, %cst_27 {dimension_numbers = #tpu.dot_dimension_numbers<[1], [0], [0], [1], [0, 0, 1, 1], [], []>} : vector<8x8xbf16>, vector<8x32xbf16>, vector<8x32xf32> -> vector<8x32xf32>
    %90 = tpu.concatenate %38, %55, %72, %89 in 1 : vector<8x32xf32>, vector<8x32xf32>, vector<8x32xf32>, vector<8x32xf32> -> vector<8x128xf32>
    %91 = arith.truncf %90 : vector<8x128xf32> to vector<8x128xbf16>
    %c0_28 = arith.constant 0 : index
    %c0_29 = arith.constant 0 : index
    %c0_30 = arith.constant 0 : index
    %92 = vector.load %arg10[%c0_28, %c0_29, %c0_30] : memref<1x128x128xbf16, #tpu.memory_space<vmem>>, vector<1x128x128xbf16>
    %93 = vector.shape_cast %92 : vector<1x128x128xbf16> to vector<128x128xbf16>
    %cst_31 = arith.constant dense<0.000000e+00> : vector<8x128xf32>
    %94 = tpu.matmul %91, %93, %cst_31 {dimension_numbers = #tpu.dot_dimension_numbers<[1], [0], [0], [1], [0, 0, 1, 1], [], []>} : vector<8x128xbf16>, vector<128x128xbf16>, vector<8x128xf32> -> vector<8x128xf32>
    %c0_32 = arith.constant 0 : index
    %c0_33 = arith.constant 0 : index
    %c0_34 = arith.constant 0 : index
    %95 = vector.load %arg11[%c0_32, %c0_33, %c0_34] : memref<1x1x128xf32, #tpu.memory_space<vmem>>, vector<1x1x128xf32>
    %96 = vector.shape_cast %95 : vector<1x1x128xf32> to vector<1x128xf32>
    %97 = vector.broadcast %96 : vector<1x128xf32> to vector<8x128xf32>
    %98 = arith.addf %94, %97 : vector<8x128xf32>
    %99 = arith.addf %3, %98 : vector<8x128xf32>
    %c0_35 = arith.constant 0 : index
    %c0_36 = arith.constant 0 : index
    %c0_37 = arith.constant 0 : index
    %100 = vector.load %arg16[%c0_35, %c0_36, %c0_37] : memref<1x1x128xf32, #tpu.memory_space<vmem>>, vector<1x1x128xf32>
    %101 = vector.shape_cast %100 : vector<1x1x128xf32> to vector<1x128xf32>
    %c0_38 = arith.constant 0 : index
    %c0_39 = arith.constant 0 : index
    %c0_40 = arith.constant 0 : index
    %102 = vector.load %arg17[%c0_38, %c0_39, %c0_40] : memref<1x1x128xf32, #tpu.memory_space<vmem>>, vector<1x1x128xf32>
    %103 = vector.shape_cast %102 : vector<1x1x128xf32> to vector<1x128xf32>
    %cst_41 = arith.constant dense<0.000000e+00> : vector<8xf32>
    %104 = vector.multi_reduction <add>, %99, %cst_41 [1] : vector<8x128xf32> to vector<8xf32>
    %105 = vector.shape_cast %104 : vector<8xf32> to vector<8x1xf32>
    %cst_42 = arith.constant 1.280000e+02 : f32
    %106 = vector.broadcast %cst_42 : f32 to vector<8x1xf32>
    %107 = arith.divf %105, %106 : vector<8x1xf32>
    %108 = vector.broadcast %107 : vector<8x1xf32> to vector<8x128xf32>
    %109 = arith.subf %99, %108 : vector<8x128xf32>
    %110 = arith.mulf %109, %109 : vector<8x128xf32>
    %cst_43 = arith.constant dense<0.000000e+00> : vector<8xf32>
    %111 = vector.multi_reduction <add>, %110, %cst_43 [1] : vector<8x128xf32> to vector<8xf32>
    %112 = vector.shape_cast %111 : vector<8xf32> to vector<8x1xf32>
    %cst_44 = arith.constant 1.280000e+02 : f32
    %113 = vector.broadcast %cst_44 : f32 to vector<8x1xf32>
    %114 = arith.divf %112, %113 : vector<8x1xf32>
    %115 = vector.broadcast %107 : vector<8x1xf32> to vector<8x128xf32>
    %116 = arith.subf %99, %115 : vector<8x128xf32>
    %cst_45 = arith.constant 9.99999974E-6 : f32
    %117 = vector.broadcast %cst_45 : f32 to vector<8x1xf32>
    %118 = arith.addf %114, %117 : vector<8x1xf32>
    %119 = math.rsqrt %118 : vector<8x1xf32>
    %120 = vector.broadcast %119 : vector<8x1xf32> to vector<8x128xf32>
    %121 = arith.mulf %116, %120 : vector<8x128xf32>
    %122 = vector.broadcast %101 : vector<1x128xf32> to vector<8x128xf32>
    %123 = arith.mulf %121, %122 : vector<8x128xf32>
    %124 = vector.broadcast %103 : vector<1x128xf32> to vector<8x128xf32>
    %125 = arith.addf %123, %124 : vector<8x128xf32>
    %126 = arith.truncf %125 : vector<8x128xf32> to vector<8x128xbf16>
    %c0_46 = arith.constant 0 : index
    %c0_47 = arith.constant 0 : index
    %c0_48 = arith.constant 0 : index
    %127 = vector.load %arg12[%c0_46, %c0_47, %c0_48] : memref<1x128x256xbf16, #tpu.memory_space<vmem>>, vector<1x128x256xbf16>
    %128 = vector.shape_cast %127 : vector<1x128x256xbf16> to vector<128x256xbf16>
    %cst_49 = arith.constant dense<0.000000e+00> : vector<8x256xf32>
    %129 = tpu.matmul %126, %128, %cst_49 {dimension_numbers = #tpu.dot_dimension_numbers<[1], [0], [0], [1], [0, 0, 1, 1], [], []>} : vector<8x128xbf16>, vector<128x256xbf16>, vector<8x256xf32> -> vector<8x256xf32>
    %c0_50 = arith.constant 0 : index
    %c0_51 = arith.constant 0 : index
    %c0_52 = arith.constant 0 : index
    %130 = vector.load %arg13[%c0_50, %c0_51, %c0_52] : memref<1x1x256xf32, #tpu.memory_space<vmem>>, vector<1x1x256xf32>
    %131 = vector.shape_cast %130 : vector<1x1x256xf32> to vector<1x256xf32>
    %132 = vector.broadcast %131 : vector<1x256xf32> to vector<8x256xf32>
    %133 = arith.addf %129, %132 : vector<8x256xf32>
    %cst_53 = arith.constant 0.000000e+00 : f32
    %134 = vector.broadcast %cst_53 : f32 to vector<8x256xf32>
    %135 = arith.maximumf %133, %134 : vector<8x256xf32>
    %136 = arith.truncf %135 : vector<8x256xf32> to vector<8x256xbf16>
    %c0_54 = arith.constant 0 : index
    %c0_55 = arith.constant 0 : index
    %c0_56 = arith.constant 0 : index
    %137 = vector.load %arg14[%c0_54, %c0_55, %c0_56] : memref<1x256x128xbf16, #tpu.memory_space<vmem>>, vector<1x256x128xbf16>
    %138 = vector.shape_cast %137 : vector<1x256x128xbf16> to vector<256x128xbf16>
    %cst_57 = arith.constant dense<0.000000e+00> : vector<8x128xf32>
    %139 = tpu.matmul %136, %138, %cst_57 {dimension_numbers = #tpu.dot_dimension_numbers<[1], [0], [0], [1], [0, 0, 1, 1], [], []>} : vector<8x256xbf16>, vector<256x128xbf16>, vector<8x128xf32> -> vector<8x128xf32>
    %c0_58 = arith.constant 0 : index
    %c0_59 = arith.constant 0 : index
    %c0_60 = arith.constant 0 : index
    %140 = vector.load %arg15[%c0_58, %c0_59, %c0_60] : memref<1x1x128xf32, #tpu.memory_space<vmem>>, vector<1x1x128xf32>
    %141 = vector.shape_cast %140 : vector<1x1x128xf32> to vector<1x128xf32>
    %142 = vector.broadcast %141 : vector<1x128xf32> to vector<8x128xf32>
    %143 = arith.addf %139, %142 : vector<8x128xf32>
    %144 = arith.addf %125, %143 : vector<8x128xf32>
    %c0_61 = arith.constant 0 : index
    %c0_62 = arith.constant 0 : index
    %c0_63 = arith.constant 0 : index
    %145 = vector.load %arg18[%c0_61, %c0_62, %c0_63] : memref<1x1x128xf32, #tpu.memory_space<vmem>>, vector<1x1x128xf32>
    %146 = vector.shape_cast %145 : vector<1x1x128xf32> to vector<1x128xf32>
    %c0_64 = arith.constant 0 : index
    %c0_65 = arith.constant 0 : index
    %c0_66 = arith.constant 0 : index
    %147 = vector.load %arg19[%c0_64, %c0_65, %c0_66] : memref<1x1x128xf32, #tpu.memory_space<vmem>>, vector<1x1x128xf32>
    %148 = vector.shape_cast %147 : vector<1x1x128xf32> to vector<1x128xf32>
    %cst_67 = arith.constant dense<0.000000e+00> : vector<8xf32>
    %149 = vector.multi_reduction <add>, %144, %cst_67 [1] : vector<8x128xf32> to vector<8xf32>
    %150 = vector.shape_cast %149 : vector<8xf32> to vector<8x1xf32>
    %cst_68 = arith.constant 1.280000e+02 : f32
    %151 = vector.broadcast %cst_68 : f32 to vector<8x1xf32>
    %152 = arith.divf %150, %151 : vector<8x1xf32>
    %153 = vector.broadcast %152 : vector<8x1xf32> to vector<8x128xf32>
    %154 = arith.subf %144, %153 : vector<8x128xf32>
    %155 = arith.mulf %154, %154 : vector<8x128xf32>
    %cst_69 = arith.constant dense<0.000000e+00> : vector<8xf32>
    %156 = vector.multi_reduction <add>, %155, %cst_69 [1] : vector<8x128xf32> to vector<8xf32>
    %157 = vector.shape_cast %156 : vector<8xf32> to vector<8x1xf32>
    %cst_70 = arith.constant 1.280000e+02 : f32
    %158 = vector.broadcast %cst_70 : f32 to vector<8x1xf32>
    %159 = arith.divf %157, %158 : vector<8x1xf32>
    %160 = vector.broadcast %152 : vector<8x1xf32> to vector<8x128xf32>
    %161 = arith.subf %144, %160 : vector<8x128xf32>
    %cst_71 = arith.constant 9.99999974E-6 : f32
    %162 = vector.broadcast %cst_71 : f32 to vector<8x1xf32>
    %163 = arith.addf %159, %162 : vector<8x1xf32>
    %164 = math.rsqrt %163 : vector<8x1xf32>
    %165 = vector.broadcast %164 : vector<8x1xf32> to vector<8x128xf32>
    %166 = arith.mulf %161, %165 : vector<8x128xf32>
    %167 = vector.broadcast %146 : vector<1x128xf32> to vector<8x128xf32>
    %168 = arith.mulf %166, %167 : vector<8x128xf32>
    %169 = vector.broadcast %148 : vector<1x128xf32> to vector<8x128xf32>
    %170 = arith.addf %168, %169 : vector<8x128xf32>
    %c0_72 = arith.constant 0 : index
    %c0_73 = arith.constant 0 : index
    %171 = vector.load %arg21[%c0_72, %c0_73] : memref<8x128xf32, #tpu.memory_space<vmem>>, vector<8x128xf32>
    tpu.vector_store %arg21[%c0_72, %c0_73], %170 {strides = array<i32>} : memref<8x128xf32, #tpu.memory_space<vmem>>, vector<8x128xf32>,
    %c1_i32 = arith.constant 1 : i32
    %172 = arith.cmpi eq, %arg1, %c1_i32 : i32
    %173 = arith.extui %172 : i1 to i32
    %c0_i32_74 = arith.constant 0 : i32
    %174 = arith.cmpi ne, %173, %c0_i32_74 : i32
    scf.if %174 {
      %c0_75 = arith.constant 0 : index
      %c0_76 = arith.constant 0 : index
      %175 = vector.load %arg21[%c0_75, %c0_76] : memref<8x128xf32, #tpu.memory_space<vmem>>, vector<8x128xf32>
      %c0_77 = arith.constant 0 : index
      %c0_78 = arith.constant 0 : index
      %176 = vector.load %arg20[%c0_77, %c0_78] : memref<8x128xf32, #tpu.memory_space<vmem>>, vector<8x128xf32>
      tpu.vector_store %arg20[%c0_77, %c0_78], %175 {strides = array<i32>} : memref<8x128xf32, #tpu.memory_space<vmem>>, vector<8x128xf32>,
    } else {
    }
    return
  }
  func.func @transform_0(%arg0: i32, %arg1: i32) -> (i32, i32) {
    %c0_i32 = arith.constant 0 : i32
    %c0_i32_0 = arith.constant 0 : i32
    return %arg0, %c0_i32 : i32, i32
  }
  func.func @transform_1(%arg0: i32, %arg1: i32) -> (i32, i32, i32) {
    %c0_i32 = arith.constant 0 : i32
    %c0_i32_0 = arith.constant 0 : i32
    %c0_i32_1 = arith.constant 0 : i32
    return %arg0, %c0_i32, %c0_i32_0 : i32, i32, i32
  }
  func.func @transform_2(%arg0: i32, %arg1: i32) -> (i32, i32) {
    %c0_i32 = arith.constant 0 : i32
    %c0_i32_0 = arith.constant 0 : i32
    %c0_i32_1 = arith.constant 0 : i32
    return %c0_i32, %c0_i32_0 : i32, i32
  }
  func.func @transform_3(%arg0: i32, %arg1: i32) -> (i32, i32) {
    %c0_i32 = arith.constant 0 : i32
    %c0_i32_0 = arith.constant 0 : i32
    %c0_i32_1 = arith.constant 0 : i32
    return %c0_i32, %c0_i32_0 : i32, i32
  }
  func.func @transform_4(%arg0: i32, %arg1: i32) -> (i32, i32) {
    %c0_i32 = arith.constant 0 : i32
    %c0_i32_0 = arith.constant 0 : i32
    %c0_i32_1 = arith.constant 0 : i32
    return %c0_i32, %c0_i32_0 : i32, i32
  }
  func.func @transform_5(%arg0: i32, %arg1: i32) -> (i32, i32) {
    %c0_i32 = arith.constant 0 : i32
    %c0_i32_0 = arith.constant 0 : i32
    %c0_i32_1 = arith.constant 0 : i32
    return %c0_i32, %c0_i32_0 : i32, i32
  }
  func.func @transform_6(%arg0: i32, %arg1: i32) -> (i32, i32, i32) {
    %c0_i32 = arith.constant 0 : i32
    %c0_i32_0 = arith.constant 0 : i32
    %c0_i32_1 = arith.constant 0 : i32
    return %arg1, %c0_i32, %c0_i32_0 : i32, i32, i32
  }
  func.func @transform_7(%arg0: i32, %arg1: i32) -> (i32, i32, i32) {
    %c0_i32 = arith.constant 0 : i32
    %c0_i32_0 = arith.constant 0 : i32
    %c0_i32_1 = arith.constant 0 : i32
    return %arg1, %c0_i32, %c0_i32_0 : i32, i32, i32
  }
  func.func @transform_8(%arg0: i32, %arg1: i32) -> (i32, i32, i32) {
    %c0_i32 = arith.constant 0 : i32
    %c0_i32_0 = arith.constant 0 : i32
    %c0_i32_1 = arith.constant 0 : i32
    return %arg1, %c0_i32, %c0_i32_0 : i32, i32, i32
  }
  func.func @transform_9(%arg0: i32, %arg1: i32) -> (i32, i32, i32) {
    %c0_i32 = arith.constant 0 : i32
    %c0_i32_0 = arith.constant 0 : i32
    %c0_i32_1 = arith.constant 0 : i32
    return %arg1, %c0_i32, %c0_i32_0 : i32, i32, i32
  }
  func.func @transform_10(%arg0: i32, %arg1: i32) -> (i32, i32, i32) {
    %c0_i32 = arith.constant 0 : i32
    %c0_i32_0 = arith.constant 0 : i32
    %c0_i32_1 = arith.constant 0 : i32
    return %arg1, %c0_i32, %c0_i32_0 : i32, i32, i32
  }
  func.func @transform_11(%arg0: i32, %arg1: i32) -> (i32, i32, i32) {
    %c0_i32 = arith.constant 0 : i32
    %c0_i32_0 = arith.constant 0 : i32
    %c0_i32_1 = arith.constant 0 : i32
    return %arg1, %c0_i32, %c0_i32_0 : i32, i32, i32
  }
  func.func @transform_12(%arg0: i32, %arg1: i32) -> (i32, i32, i32) {
    %c0_i32 = arith.constant 0 : i32
    %c0_i32_0 = arith.constant 0 : i32
    %c0_i32_1 = arith.constant 0 : i32
    return %arg1, %c0_i32, %c0_i32_0 : i32, i32, i32
  }
  func.func @transform_13(%arg0: i32, %arg1: i32) -> (i32, i32, i32) {
    %c0_i32 = arith.constant 0 : i32
    %c0_i32_0 = arith.constant 0 : i32
    %c0_i32_1 = arith.constant 0 : i32
    return %arg1, %c0_i32, %c0_i32_0 : i32, i32, i32
  }
  func.func @transform_14(%arg0: i32, %arg1: i32) -> (i32, i32, i32) {
    %c0_i32 = arith.constant 0 : i32
    %c0_i32_0 = arith.constant 0 : i32
    %c0_i32_1 = arith.constant 0 : i32
    return %arg1, %c0_i32, %c0_i32_0 : i32, i32, i32
  }
  func.func @transform_15(%arg0: i32, %arg1: i32) -> (i32, i32, i32) {
    %c0_i32 = arith.constant 0 : i32
    %c0_i32_0 = arith.constant 0 : i32
    %c0_i32_1 = arith.constant 0 : i32
    return %arg1, %c0_i32, %c0_i32_0 : i32, i32, i32
  }
  func.func @transform_16(%arg0: i32, %arg1: i32) -> (i32, i32, i32) {
    %c0_i32 = arith.constant 0 : i32
    %c0_i32_0 = arith.constant 0 : i32
    %c0_i32_1 = arith.constant 0 : i32
    return %arg1, %c0_i32, %c0_i32_0 : i32, i32, i32
  }
  func.func @transform_17(%arg0: i32, %arg1: i32) -> (i32, i32, i32) {
    %c0_i32 = arith.constant 0 : i32
    %c0_i32_0 = arith.constant 0 : i32
    %c0_i32_1 = arith.constant 0 : i32
    return %arg1, %c0_i32, %c0_i32_0 : i32, i32, i32
  }
  func.func @transform_18(%arg0: i32, %arg1: i32) -> (i32, i32) {
    %c0_i32 = arith.constant 0 : i32
    %c0_i32_0 = arith.constant 0 : i32
    return %arg0, %c0_i32 : i32, i32
  }
}

</mosaic_0001>

<bundles_post_ra>
// kernel: tpu_custom_call.1
= control target key start
LH: loop header
LB: loop body
LE: loop exit
PB: predicated region body
PF: predicated region fallthrough
CT: control target
= control target key end

     0   :  { %s4303_s0 = inlined_call_operand.hbm [shape: f32[16,64], index: 0, kind: input, shape index: {}]   ;;  %s4304_s1 = inlined_call_operand.hbm [shape: f32[2,8,8], index: 1, kind: input, shape index: {}]   ;;  %s4305_s2 = inlined_call_operand.hbm [shape: bf16[64,128], index: 2, kind: input, shape index: {}]   ;;  %s4306_s3 = inlined_call_operand.hbm [shape: f32[1,128], index: 3, kind: input, shape index: {}]   ;;  %s4307_s4 = inlined_call_operand.hbm [shape: f32[1,128], index: 4, kind: input, shape index: {}]   ;;  %s4308_s5 = inlined_call_operand.hbm [shape: f32[1,128], index: 5, kind: input, shape index: {}]   ;;  %s4309_s6 = inlined_call_operand.hbm [shape: bf16[2,128,384], index: 6, kind: input, shape index: {}]   ;;  %s4310_s7 = inlined_call_operand.vmem [shape: f32[2,1,384], index: 7, kind: input, shape index: {}]   ;;  %s4311_s8 = inlined_call_operand.hbm [shape: bf16[2,128,128], index: 8, kind: input, shape index: {}]   ;;  %s4312_s9 = inlined_call_operand.hbm [shape: f32[2,1,128], index: 9, kind: input, shape index: {}]   ;;  %s4313_s10 = inlined_call_operand.hbm [shape: bf16[2,128,256], index: 10, kind: input, shape index: {}]   ;;  %s4314_s11 = inlined_call_operand.vmem [shape: f32[2,1,256], index: 11, kind: input, shape index: {}]   ;;  %s4315_s12 = inlined_call_operand.hbm [shape: bf16[2,256,128], index: 12, kind: input, shape index: {}]   ;;  %s4316_s13 = inlined_call_operand.vmem [shape: f32[2,1,128], index: 13, kind: input, shape index: {}]   ;;  %s4317_s14 = inlined_call_operand.hbm [shape: f32[2,1,128], index: 14, kind: input, shape index: {}]   ;;  %s4318_s15 = inlined_call_operand.vmem [shape: f32[2,1,128], index: 15, kind: input, shape index: {}]   ;;  %s4319_s16 = inlined_call_operand.hbm [shape: f32[2,1,128], index: 16, kind: input, shape index: {}]   ;;  %s4320_s17 = inlined_call_operand.vmem [shape: f32[2,1,128], index: 17, kind: input, shape index: {}]   ;;  %s4321_s18 = inlined_call_operand.hbm [shape: f32[16,128], index: 18, kind: output, shape index: {}]  }
   0x1   :  { %4352 = sst [smem:[#allocation54_spill]] %s4303_s0 }
   0x2   :  { %4353 = sst [smem:[#allocation55_spill]] %s4304_s1 }
   0x3   :  { %4354 = sst [smem:[#allocation56_spill]] %s4305_s2 }
   0x4   :  { %4355 = sst [smem:[#allocation57_spill]] %s4306_s3 }
   0x5   :  { %4356 = sst [smem:[#allocation58_spill]] %s4307_s4 }
   0x6   :  { %4357 = sst [smem:[#allocation59_spill]] %s4308_s5 }
   0x7   :  { %4358 = sst [smem:[#allocation60_spill]] %s4309_s6 }
   0x8   :  { %4359 = sst [smem:[#allocation61_spill]] %s4310_s7 }
   0x9   :  { %4360 = sst [smem:[#allocation62_spill]] %s4311_s8 }
   0xa   :  { %4361 = sst [smem:[#allocation63_spill]] %s4312_s9 }
   0xb   :  { %4362 = sst [smem:[#allocation64_spill]] %s4313_s10 }
   0xc   :  { %4363 = sst [smem:[#allocation65_spill]] %s4314_s11 }
   0xd   :  { %4364 = sst [smem:[#allocation66_spill]] %s4315_s12 }
   0xe   :  { %4365 = sst [smem:[#allocation67_spill]] %s4316_s13 }
   0xf   :  { %4366 = sst [smem:[#allocation68_spill]] %s4317_s14 }
  0x10   :  { %4367 = sst [smem:[#allocation69_spill]] %s4318_s15 }
  0x11   :  { %4368 = sst [smem:[#allocation70_spill]] %s4319_s16 }
  0x12   :  { %4369 = sst [smem:[#allocation71_spill]] %s4320_s17 }
  0x13   :  { %4370 = sst [smem:[#allocation72_spill]] %s4321_s18 }
  0x14   :  { %23 = vsyncpa [#allocation4], 0 }
  0x15   :  { %25 = vsyncpa [#allocation4 + $0x1], 0 }
  0x16   :  { %26 = vsyncpa [#allocation7], 0 }
  0x17   :  { %28 = vsyncpa [#allocation7 + $0x1], 0 }
  0x18   :  { %29 = vsyncpa [#allocation10], 0 }
  0x19   :  { %30 = vsyncpa [#allocation13], 0 }
  0x1a   :  { %31 = vsyncpa [#allocation5], 0 }
  0x1b   :  { %33 = vsyncpa [#allocation5 + $0x1], 0  ;;  %s3670_s27 = smov 0   ;;  %s3672_s28 = smov 0  }
  0x1c   :  { %s3674_s29 = smov 0   ;;  %s3676_s30 = smov 0  }
  0x1d   :  { %s3678_s0 = smov 0   ;;  %s3680_s19 = smov 0  }
  0x1e   :  { %s3682_s1 = smov 0   ;;  %s3684_s20 = smov 0  }
  0x1f   :  { %s3686_s21 = smov 0   ;;  %s3688_s22 = smov 0  }
  0x20   :  { %s3690_s2 = smov 0  }
  0x21 LB: > { %4371 = sst [smem:[#allocation35_spill]] %s3522_s28  ;;  %s3726_s23 = sadd.s32 4294967295, %s3558_s2   ;;  %s3558_s2 = sphi %s3690_s2, %s39_s2   ;;  %s3554_s22 = sphi %s3688_s22, %s4453_s22   ;;  %s3550_s21 = sphi %s3686_s21, %s4452_s21   ;;  %s3546_s20 = sphi %s3684_s20, %s4451_s20   ;;  %s3542_s1 = sphi %s3682_s1, %s4450_s1   ;;  %s3538_s19 = sphi %s3680_s19, %s4449_s19   ;;  %s3534_s0 = sphi %s3678_s0, %s4455_s0   ;;  %s3530_s30 = sphi %s3676_s30, %s4454_s30   ;;  %s3526_s29 = sphi %s3674_s29, %s4447_s29   ;;  %s3522_s28 = sphi %s3672_s28, %s4446_s28   ;;  %s3518_s27 = sphi %s3670_s27, %s4445_s27  }
  0x22   : > { %4372 = sst [smem:[#allocation36_spill]] %s3526_s29  ;;  %p2379_p0 = scmp.ge.s32.totalorder %s3558_s2, 1 }
  0x23   : > { %4373 = sst [smem:[#allocation37_spill]] %s3530_s30  ;;  %p72_p1 = scmp.eq.s32.totalorder %s3726_s23, 0 }
  0x24   : > { %4374 = sst [smem:[#allocation38_spill]] %s3538_s19  ;;  %p530_p2 = scmp.lt.s32.totalorder %s3558_s2, 5 }
  0x25   : > { %4375 = sst [smem:[#allocation39_spill]] %s3542_s1  ;;  %s3560_s17 = smov [#allocation8]  }
  0x26   : > { %4376 = sst [smem:[#allocation40_spill]] %s3546_s20  ;;  %p3734_p3 = pnand %p2379_p0, %p530_p2 }
  0x27   : > { %4377 = sst [smem:[#allocation41_spill]] %s3550_s21  ;;  %s543_s15 = sshll.u32 %s3560_s17, 4  ;;  %s544_s15 = int_to_ptr.vmem [resolvable:$true] %s543_s15 }
  0x28   : > { %4378 = sst [smem:[#allocation42_spill]] %s3554_s22  ;;  %p2809_p4 = pneg %p3734_p3 }
  0x29   : > { %4379 = sst [smem:[#allocation43_spill]] %s3558_s2  ;;  %s4323_s25 = smov 64  }
  0x2a   : > { %4380 = sst [smem:[#allocation44_spill]] %s3726_s23  ;;  %p3742_p5 = pnand %p2809_p4, %p72_p1 }
  0x2b   : > { %s4381_s26 = sld [smem:[#allocation56_spill]]  ;;  %s2378_s17 = sadd.s32 4294967294, %s3558_s2  }
  0x2c   : > { %s4382_s20 = scalar_select %p3734_p3, 1, 0 }
  0x2d   : > { %s48_s7 = sadd.s32 1, %s3550_s21  ;;  %s51_s13 = sadd.s32 1, %s3554_s22 }
  0x2e   : > { %4383 = sst [smem:[#allocation45_spill]] %s4382_s20  ;;  %p49_p6 = scmp.ge.s32.totalorder %s48_s7, 2 }
  0x2f   : > { %s58_s11 = sadd.s32 1, %s3538_s19  ;;  %p4333_p7 = scmp.ne.s32.totalorder %s3538_s19, %s3534_s0 }
  0x30   : > { %p66_p8 = scmp.eq.s32.totalorder %s3558_s2, 0  ;;  %s4457_s7 = smov (%p49_p6, %s48_s7), 0 }
  0x31   : > { %s541_s18 = sshll.u32 %s4381_s26, 4  ;;  %s4325_s26 = smov 4   ;;  %s542_s18 = int_to_ptr.hbm [resolvable:$true] %s541_s18 }
  0x32   : > { %2812 = dma.hbm_to_vmem [thread:$0]  (!%p3742_p5), %s542_s18, 512, %s544_s15, [#allocation7], %s4323_s25, %s4323_s25, %s4325_s26  }
  0x33   : > { %4385 = sst [smem:[#allocation46_spill]] %s4457_s7  ;;  %s4459_s13 = smov (!%p49_p6, %s51_s13), %s3554_s22 }
  0x34   : > { %p3766_p9 = por %p66_p8, %p4333_p7  ;;  %p4332_p10 = scmp.ne.s32.totalorder %s3534_s0, %s3530_s30 }
  0x35   : > { %p53_p11 = scmp.ge.s32.totalorder %s4459_s13, 2  ;;  %s191_s18 = ssub.s32 %s3550_s21, %s4457_s7 }
  0x36   : > { %p3779_p12 = por %p72_p1, %p4332_p10  ;;  %p192_p13 = scmp.eq.s32.totalorder %s191_s18, 0 }
  0x37   : > { %s4461_s13 = smov (%p53_p11, %s4459_s13), 0  ;;  %s194_s26 = sadd.s32 1, %s3526_s29 }
  0x38   : > { %s4387_s25 = scalar_select %p3779_p12, 1, 0 }
  0x39   : > { %4389 = sst [smem:[#allocation48_spill]] %s4461_s13  ;;  %p201_p0 = scmp.ne.s32.totalorder %s3526_s29, %s3522_s28 }
  0x3a   : > { %4388 = sst [smem:[#allocation47_spill]] %s4387_s25  ;;  %s55_s7 = ssub.s32 %s3554_s22, %s4461_s13 }
  0x3b   : > { %p207_p2 = scmp.ne.s32.totalorder %s3522_s28, %s3518_s27  ;;  %p56_p4 = scmp.eq.s32.totalorder %s55_s7, 0 }
  0x3c   : > { %p3794_p6 = por %p201_p0, %p66_p8  ;;  %p517_p10 = scmp.eq.s32.totalorder %s3726_s23, 3 }
  0x3d   : > { %s3799_s25 = scalar_select %p192_p13, %s3526_s29, %s194_s26  }
  0x3e   : > { %s3802_s18 = scalar_select %p56_p4, %s3538_s19, %s58_s11  }
  0x3f   : > { %4391 = sst [smem:[#allocation49_spill]] %s3799_s25  ;;  %p3806_p11 = por %p207_p2, %p72_p1 }
  0x40   : > { %4392 = sst [smem:[#allocation50_spill]] %s3802_s18  ;;  %p523_p7 = scmp.eq.s32.totalorder %s2378_s17, 3 }
  0x41   : > { %s4393_s20 = scalar_select %p3806_p11, 1, 0 }
  0x42   : > { %p2858_p12 = scmp.lt.s32.totalorder %s3558_s2, 4  ;;  %p4395_p8 = scmp.ne.s32.totalorder %s3538_s19, %s3534_s0 }
  0x43   : > { %4394 = sst [smem:[#allocation51_spill]] %s4393_s20  ;;  %s593_s27 = sand.u32 1, %s3558_s2  }
  0x44   : > { %p3815_p0 = por %p517_p10, %p4395_p8  ;;  %p4398_p13 = scmp.ne.s32.totalorder %s3534_s0, %s3530_s30 }
  0x45   : > { %s595_s26 = sand.u32 1, %s3538_s19   ;;  %s2386_s13 = sshll.u32 %s3554_s22, 3 }
  0x46   : > { %s4396_s7 = scalar_select %p3815_p0, 1, 0 }
  0x47   : > { %p3823_p4 = por %p523_p7, %p4398_p13  ;;  %s2385_s18 = sshll.u32 %s595_s26, 3 }
  0x48   : > { %4397 = sst [smem:[#allocation52_spill]] %s4396_s7  ;;  %s597_s16 = scalar_lea.vmem [#allocation3], %s2385_s18 }
  0x49   : > { %s4399_s11 = scalar_select %p3823_p4, 1, 0 }
  0x4a   : > { %s4401_s17 = sld [smem:[#allocation54_spill]]  ;;  %s605_s14 = sshll.u32 %s597_s16, 4  ;;  %s606_s14 = int_to_ptr.vmem [resolvable:$true] %s605_s14 }
  0x4b   : > { %4400 = sst [smem:[#allocation53_spill]] %s4399_s11  ;;  %p2823_p7 = pnand %p2858_p12, %p3766_p9 }
  0x4c   : > { %s4402_s11 = sld [smem:[#allocation55_spill]]  ;;  %p3843_p10 = pnand %p2858_p12, %p3794_p6 }
  0x4d   : > { %s616_s16 = scalar_lea.vmem [#allocation6], %s2385_s18  ;;  %s3850_s30 = scalar_lea.sflag [#allocation7], %s593_s27 }
  0x4e   : > { %s624_s25 = sshll.u32 %s616_s16, 4  ;;  %s2770_s1 = smul.u32 192, %s3550_s21  ;;  %s625_s25 = int_to_ptr.vmem [resolvable:$true] %s624_s25 }
  0x4f   : > { %s4404_s6 = sld [smem:[#allocation60_spill]]  ;;  %s2698_s16 = sshll.u32 %s3550_s21, 6 }
  0x50   : > { %s601_s28 = scalar_lea.hbm %s4401_s17, %s2386_s13  ;;  %s3563_s17 = smov 192  }
  0x51   : > { %s603_s23 = sshll.u32 %s601_s28, 4  ;;  %s3847_s28 = scalar_lea.sflag [#allocation4], %s593_s27  ;;  %s604_s23 = int_to_ptr.hbm [resolvable:$true] %s603_s23 }
  0x52   : > { %s620_s19 = scalar_lea.hbm %s4402_s11, %s2386_s13  ;;  %s3854_s13 = sand.u32 1, %s3526_s29  }
  0x53   : > { %2825 = dma.hbm_to_vmem [thread:$0]  (!%p2823_p7), %s604_s23, 128, %s606_s14, %s3847_s28  }
  0x54   : > { %s622_s20 = sshll.u32 %s620_s19, 4  ;;  %s2769_s15 = smul.u32 192, %s3854_s13  ;;  %s623_s20 = int_to_ptr.hbm [resolvable:$true] %s622_s20 }
  0x55   : > { %2828 = dma.hbm_to_vmem [thread:$0]  (!%p2823_p7), %s623_s20, 128, %s625_s25, %s3850_s30  }
  0x56   : > { %s640_s19 = scalar_lea.hbm %s4404_s6, %s2770_s1  ;;  %s635_s18 = scalar_lea.vmem [#allocation14], %s2769_s15 }
  0x57   : > { %s641_s23 = sshll.u32 %s640_s19, 4  ;;  %s643_s27 = sshll.u32 %s635_s18, 4  ;;  %s642_s23 = int_to_ptr.hbm [resolvable:$true] %s641_s23  ;;  %s644_s27 = int_to_ptr.vmem [resolvable:$true] %s643_s27 }
  0x58   : > { %s2390_s11 = sshll.u32 %s3854_s13, 6  ;;  %s3564_s20 = smov 12  }
  0x59   : > { %2831 = dma.hbm_to_vmem [thread:$0]  (!%p3843_p10), %s642_s23, 3072, %s644_s27, %s3847_s28, %s3563_s17, %s3563_s17, %s3564_s20  }
  0x5a   : > { %s4405_s8 = sld [smem:[#allocation62_spill]]  ;;  %s664_s14 = scalar_lea.vmem [#allocation15], %s2390_s11 }
  0x5b   : > { %s672_s19 = sshll.u32 %s664_s14, 4  ;;  %s4406_s15 = smov 4   ;;  %s673_s19 = int_to_ptr.vmem [resolvable:$true] %s672_s19 }
  0x5c   : > { %s4407_s18 = smov 64   ;;  %s4408_s9 = sld [smem:[#allocation63_spill]] }
  0x5d   : > { %s685_s20 = scalar_lea.vmem [#allocation16], %s3854_s13  ;;  %s4409_s3 = sld [smem:[#allocation57_spill]] }
  0x5e   : > { %s692_s25 = sshll.u32 %s685_s20, 4  ;;  %s3565_s14 = smov [#allocation9]   ;;  %s693_s25 = int_to_ptr.vmem [resolvable:$true] %s692_s25 }
  0x5f   : > { %s2699_s23 = sshll.u32 %s3550_s21, 7  ;;  %s4410_s10 = sld [smem:[#allocation64_spill]] }
  0x60   : > { %s669_s1 = scalar_lea.hbm %s4405_s8, %s2698_s16  ;;  %s3567_s7 = smov 8  }
  0x61   : > { %s670_s6 = sshll.u32 %s669_s1, 4  ;;  %s4411_s12 = sld [smem:[#allocation66_spill]]  ;;  %s671_s6 = int_to_ptr.hbm [resolvable:$true] %s670_s6 }
  0x62   : > { %2834 = dma.hbm_to_vmem [thread:$0]  (!%p3843_p10), %s671_s6, 1024, %s673_s19, %s3850_s30, %s4407_s18, %s4407_s18, %s4406_s15  }
  0x63   : > { %s688_s17 = scalar_lea.hbm %s4408_s9, %s3550_s21  ;;  %s556_s1 = sshll.u32 %s4409_s3, 4  ;;  %s557_s1 = int_to_ptr.hbm [resolvable:$true] %s556_s1 }
  0x64   : > { %s690_s16 = sshll.u32 %s688_s17, 4  ;;  %s558_s6 = sshll.u32 %s3565_s14, 4  ;;  %s691_s16 = int_to_ptr.hbm [resolvable:$true] %s690_s16  ;;  %s559_s6 = int_to_ptr.vmem [resolvable:$true] %s558_s6 }
  0x65   : > { %2837 = dma.hbm_to_vmem [thread:$0]  (!%p3843_p10), %s691_s16, 16, %s693_s25, %s3847_s28  }
  0x66   : > { %s2393_s19 = sshll.u32 %s3854_s13, 7  ;;  %s708_s11 = scalar_lea.hbm %s4410_s10, %s2699_s23 }
  0x67   : > { %2815 = dma.hbm_to_vmem [thread:$0]  (!%p3742_p5), %s557_s1, 16, %s559_s6, [#allocation10]  }
  0x68   : > { %s703_s27 = scalar_lea.vmem [#allocation17], %s2393_s19  ;;  %s709_s25 = sshll.u32 %s708_s11, 4  ;;  %s710_s25 = int_to_ptr.hbm [resolvable:$true] %s709_s25 }
  0x69   : > { %s711_s17 = sshll.u32 %s703_s27, 4  ;;  %s3566_s16 = smov 128   ;;  %s712_s17 = int_to_ptr.vmem [resolvable:$true] %s711_s17 }
  0x6a   : > { %2840 = dma.hbm_to_vmem [thread:$0]  (!%p3843_p10), %s710_s25, 2048, %s712_s17, %s3850_s30, %s3566_s16, %s3566_s16, %s3567_s7  }
  0x6b   : > { %s737_s1 = scalar_lea.hbm %s4411_s12, %s2699_s23  ;;  %s732_s9 = scalar_lea.vmem [#allocation18], %s2393_s19 }
  0x6c   : > { %s738_s6 = sshll.u32 %s737_s1, 4  ;;  %s740_s27 = sshll.u32 %s732_s9, 4  ;;  %s739_s6 = int_to_ptr.hbm [resolvable:$true] %s738_s6  ;;  %s741_s27 = int_to_ptr.vmem [resolvable:$true] %s740_s27 }
  0x6d   : > { %2843 = dma.hbm_to_vmem [thread:$0]  (!%p3843_p10), %s739_s6, 2048, %s741_s27, %s3847_s28, %s4407_s18, %s4407_s18, %s4406_s15  }
  0x6e   : > { %s4412_s4 = sld [smem:[#allocation58_spill]]  ;;  %s3568_s3 = smov [#allocation11]  }
  0x6f   : > { %s570_s19 = sshll.u32 %s3568_s3, 4  ;;  %s4413_s5 = sld [smem:[#allocation59_spill]]  ;;  %s571_s19 = int_to_ptr.vmem [resolvable:$true] %s570_s19 }
  0x70   : > { %s3569_s15 = smov [#allocation12]   ;;  %s4414_s7 = sld [smem:[#allocation68_spill]] }
  0x71   : > { %s582_s18 = sshll.u32 %s3569_s15, 4  ;;  %s759_s6 = scalar_lea.vmem [#allocation19], %s3854_s13  ;;  %s583_s18 = int_to_ptr.vmem [resolvable:$true] %s582_s18 }
  0x72   : > { %s766_s27 = sshll.u32 %s759_s6, 4  ;;  %s782_s9 = scalar_lea.vmem [#allocation20], %s3854_s13  ;;  %s767_s27 = int_to_ptr.vmem [resolvable:$true] %s766_s27 }
  0x73   : > { %s789_s23 = sshll.u32 %s782_s9, 4  ;;  %s4418_s15 = sld [smem:[#allocation47_spill]] (!%p3734_p3)  ;;  %s790_s23 = int_to_ptr.vmem [resolvable:$true] %s789_s23 }
  0x74   : > { %s568_s17 = sshll.u32 %s4412_s4, 4  ;;  %s569_s17 = int_to_ptr.hbm [resolvable:$true] %s568_s17 }
  0x75   : > { %s580_s11 = sshll.u32 %s4413_s5, 4  ;;  %s581_s11 = int_to_ptr.hbm [resolvable:$true] %s580_s11 }
  0x76   : > { %2818 = dma.hbm_to_vmem [thread:$0]  (!%p3742_p5), %s569_s17, 16, %s571_s19, [#allocation10]  }
  0x77   : > { %s762_s14 = scalar_lea.hbm %s4414_s7, %s3550_s21  ;;  %s4415_s17 = sld [smem:[#allocation70_spill]] }
  0x78   : > { %2821 = dma.hbm_to_vmem [thread:$0]  (!%p3742_p5), %s581_s11, 16, %s583_s18, [#allocation13]  }
  0x79   : > { %s764_s1 = sshll.u32 %s762_s14, 4  ;;  %s4417_s11 = sld [smem:[#allocation44_spill]] (!%p3734_p3)  ;;  %s765_s1 = int_to_ptr.hbm [resolvable:$true] %s764_s1 }
  0x7a   : > { %2846 = dma.hbm_to_vmem [thread:$0]  (!%p3843_p10), %s765_s1, 16, %s767_s27, %s3850_s30  }
  0x7b   : > { %804 = sbr.rel (%p3734_p3) target bundleno = 2799 (0xaef), region = 92  ;;  %s4346_s30 = sand.u32 (!%p3734_p3), 1, %s3534_s0  }
  0x7c   : > { %s3937_s25 = sshll.u32 (!%p3734_p3), %s4346_s30, 3  ;;  %p4419_p5 = scmp.ne.s32.totalorder (!%p3734_p3), %s4418_s15, 0 }
  0x7d   : > { %s785_s3 = scalar_lea.hbm %s4415_s17, %s3550_s21 }
  0x7e   : > { %s787_s19 = sshll.u32 %s785_s3, 4  ;;  %s788_s19 = int_to_ptr.hbm [resolvable:$true] %s787_s19 }
  0x7f   : > { %2849 = dma.hbm_to_vmem [thread:$0]  (!%p3843_p10), %s788_s19, 16, %s790_s23, %s3847_s28  }
  0x80   : > { %s806_s18 = sand.u32 1, %s4417_s11  }
  0x81   : > { %s3939_s16 = scalar_lea.sflag [#allocation4], %s806_s18 }
  0x82   : > { %3465 = dma.done.wait (%p4419_p5), %s3939_s16, 128  }
  0x83   : > { %3467 = vsyncadd (%p4419_p5), %s3939_s16, 4294967168  ;;  %s3948_s26 = scalar_lea.sflag [#allocation7], %s806_s18 }
  0x84   : > { %3469 = dma.done.wait (%p4419_p5), %s3948_s26, 128  }
  0x85   : > { %3471 = vsyncadd (%p4419_p5), %s3948_s26, 4294967168 }
  0x86   : > { %3473 = dma.done.wait (%p72_p1), [#allocation7], 512  }
  0x87   : > { %3475 = vsyncadd (%p72_p1), [#allocation7], 4294966784 }
  0x88   : > { %3477 = dma.done.wait (%p72_p1), [#allocation10], 32  }
  0x89   : > { %3479 = vsyncadd (%p72_p1), [#allocation10], 4294967264 }
  0x8a   : > { %3481 = dma.done.wait (%p72_p1), [#allocation13], 16  }
  0x8b   : > { %3483 = vsyncadd (%p72_p1), [#allocation13], 4294967280  ;;  %s4420_s7 = sld [smem:[#allocation35_spill]] }
  0x91   : > { %s3970_s1 = sand.u32 1, %s4420_s7  }
  0x92   : > { %s2771_s6 = smul.u32 192, %s3970_s1 }
  0x94   : > { %s3973_s27 = scalar_lea.vmem [#allocation14], %s2771_s6 }
  0x95   : > { %3485 = dma.done.wait (%p3806_p11), %s3939_s16, 3072  }
  0x96   : > { %3487 = vsyncadd (%p3806_p11), %s3939_s16, 4294964224  ;;  %s2406_s8 = sshll.u32 %s3970_s1, 6 }
  0x97   : > { %s3982_s20 = scalar_lea.vmem [#allocation15], %s2406_s8 }
  0x98   : > { %3489 = dma.done.wait (%p3806_p11), %s3948_s26, 1024  }
  0x99   : > { %3491 = vsyncadd (%p3806_p11), %s3948_s26, 4294966272 }
  0x9a   : > { %3493 = dma.done.wait (%p3806_p11), %s3939_s16, 16  }
  0x9b   : > { %3495 = vsyncadd (%p3806_p11), %s3939_s16, 4294967280  ;;  %s2407_s3 = sshll.u32 %s3970_s1, 7 }
  0x9c   : > { %s3998_s19 = scalar_lea.vmem [#allocation17], %s2407_s3 }
  0x9d   : > { %3497 = dma.done.wait (%p3806_p11), %s3948_s26, 2048  }
  0x9e   : > { %3499 = vsyncadd (%p3806_p11), %s3948_s26, 4294965248  ;;  %s4006_s9 = scalar_lea.vmem [#allocation18], %s2407_s3 }
  0x9f   : > { %3501 = dma.done.wait (%p3806_p11), %s3939_s16, 2048  }
  0xa0   : > { %3503 = vsyncadd (%p3806_p11), %s3939_s16, 4294965248 }
  0xa1   : > { %3505 = dma.done.wait (%p3806_p11), %s3948_s26, 16  }
  0xa2   : > { %3507 = vsyncadd (%p3806_p11), %s3948_s26, 4294967280 }
  0xa3   : > { %3509 = dma.done.wait (%p3806_p11), %s3939_s16, 16  }
  0xa4   : > { %3511 = vsyncadd (%p3806_p11), %s3939_s16, 4294967280  ;;  %s4422_s11 = sld [smem:[#allocation39_spill]]  ;;  %s1014_s7 = scalar_lea.vmem [#allocation21], %s3937_s25 }
  0xa5   : > { %s4423_s8 = sld [smem:[#allocation65_spill]] }
  0xa6   : > { %s4424_s30 = sld [smem:[#allocation67_spill]] }
  0xa7   : > { %s4425_s28 = sld [smem:[#allocation61_spill]] }
  0xa8   : > { %s4426_s10 = sld [smem:[#allocation69_spill]] }
  0xa9   : > { %s4427_s29 = sld [smem:[#allocation71_spill]] }
  0xaa   : > { %p1015_p1 = scmp.lt.s32.totalorder %s4422_s11, 1  ;;  %p2411_p3 = scmp.ne.s32.totalorder %s4422_s11, 0 }
  0xac   : > { %s4030_s15 = scalar_select %p1015_p1, %s4422_s11, 1 }
  0xad   : > { %1036 = sbr.rel (%p2411_p3) target bundleno = 589 (0x24d), region = 148 }
  0xae   : > { %s2772_s18 = smul.u32 3, %s4030_s15  ;;  %s2410_s26 = sshll.u32 %s4030_s15, 1 }
  0xaf   : > { %s4037_s3 = scalar_lea.vmem %s4423_s8, %s2410_s26  ;;  %s1025_s24 = scalar_lea.vmem %s4424_s30, %s4030_s15 }
  0xb0   : > { %s4046_s13 = scalar_lea.vmem %s4425_s28, %s2772_s18  ;;  %s1028_s12 = scalar_lea.vmem %s4426_s10, %s4030_s15 }
  0xb1   : > { %s1031_s2 = scalar_lea.vmem %s4427_s29, %s4030_s15  ;;  %s4428_s30 = scalar_lea.vmem (!%p2411_p3), [#allocation3], %s3937_s25 }
  0xb2   : > { %v2704_v0 = vld [vmem:[#allocation8 + $0x18] sm:$0xff]  ;;  %v2703_v1 = vld [vmem:[#allocation8 + $0x10] sm:$0xff]  ;;  %v2702_v2 = vld [vmem:[#allocation8 + $0x8] sm:$0xff]  ;;  %vm1075_vm0 = vcmask 523264   ;;  %v3570_v10 = vmov 128.0  }
  0xb3   : > { %1083 = vmatpush.bf16.msra.mxu0 %v2704_v0  ;;  %v2701_v3 = vld [vmem:[#allocation8] sm:$0xff]  ;;  %2970 = vrcp.f32 %v3570_v10 }
  0xb4   : > { %v1037_v4 = vld [vmem:[%s4428_s30] sm:$0xff] }
  0xb5   : > { %v1038_v5 = vpack.c.bf16 %v1037_v4, %v1037_v4  ;;  %v2967_v6 = vld [vmem:[#allocation9] ss:$0 sm:$0xff]  ;;  %v2968_v30 = vld [vmem:[#allocation11] ss:$0 sm:$0xff]  ;;  %v2969_v32 = vld [vmem:[#allocation12] ss:$0 sm:$0xff] }
  0xb7   : > { %1084 = vmatpush.bf16.msra.mxu0 %v2703_v1 }
  0xb9   : > { %v2971_v11 = vpop.eup %2970 }
  0xba   : > { %v1097_v12 = vmul.f32 128.0, %v2971_v11  ;;  %vm1101_vm1 = vweird.f32 %v2971_v11 }
  0xbb   : > { %1085 = vmatpush.bf16.msra.mxu0 %v2702_v2 }
  0xbc   : > { %v1098_v13 = vsub.f32 1.0, %v1097_v12 }
  0xbe   : > { %v1099_v14 = vmul.f32 %v2971_v11, %v1098_v13 }
  0xbf   : > { %1086 = vmatpush.bf16.msra.mxu0 %v2701_v3 }
  0xc0   : > { %v1100_v15 = vadd.f32 %v2971_v11, %v1099_v14 }
  0xc2   : > { %2428 = vmatmul.msk.bf16.vlgmr.msra.gmra.mxu0 %vm1075_vm0, %v1038_v5  ;;  %v1102_v16 = vsel %vm1101_vm1, %v2971_v11, %v1100_v15 }
 0x13f   : > { %v1088_v7 = vpop.f32.mrf.mxu0 }
 0x140   : > { %v1089_v8 = vadd.f32 %v2967_v6, %v1088_v7 }
 0x142   : > { %1094 = vadd.xlane.f32.xlu0 %v1089_v8 }
 0x147   : > { %v1090_v9 = vpop.f32.mrf.mxu0 }
 0x1b5   : > { %v1095_v17 = vpop.xlane.xlu0 %1094 }
 0x1b6   : > { %v1103_v18 = vmul.f32 %v1102_v16, %v1095_v17 }
 0x1b8   : > { %v1104_v19 = vsub.f32 %v1089_v8, %v1103_v18 }
 0x1ba   : > { %v1105_v20 = vmul.f32 %v1104_v19, %v1104_v19 }
 0x1bc   : > { %1106 = vadd.xlane.f32.xlu0 %v1105_v20 }
 0x22f   : > { %v1107_v21 = vpop.xlane.xlu0 %1106 }
 0x230   : > { %v1108_v22 = vmul.f32 %v1107_v21, %v1102_v16 }
 0x232   : > { %v1109_v23 = vadd.f32 1e-05, %v1108_v22 }
 0x234   : > { %2972 = vrsqrt.f32 %v1109_v23  ;;  %vm1116_vm3 = vweird.f32 %v1109_v23 }
 0x23a   : > { %v2973_v24 = vpop.eup %2972 }
 0x23b   : > { %v1111_v25 = vmul.f32 %v2973_v24, %v1109_v23  ;;  %vm1117_vm2 = vweird.f32 %v2973_v24 }
 0x23c   : > { %vm1118_vm4 = vmor %vm1116_vm3, %vm1117_vm2 }
 0x23d   : > { %v1112_v26 = vmul.f32 %v2973_v24, %v1111_v25 }
 0x23f   : > { %v1113_v27 = vmul.f32 0.5, %v1112_v26 }
 0x241   : > { %v1114_v28 = vsub.f32 1.5, %v1113_v27 }
 0x243   : > { %v1115_v29 = vmul.f32 %v2973_v24, %v1114_v28 }
 0x245   : > { %v1119_v31 = vsel %vm1118_vm4, %v2973_v24, %v1115_v29 }
 0x246   : > { %v1120_v33 = vmul.f32 %v1119_v31, %v1104_v19 }
 0x248   : > { %v1124_v34 = vmul.f32 %v2968_v30, %v1120_v33 }
 0x24a   : > { %v1128_v35 = vadd.f32 %v2969_v32, %v1124_v34 }
 0x24c   : > { %1129 = vst [vmem:[#allocation2] sm:$0xff] %v1128_v35 }
 0x24d PF: > { %v2515_v36 = vld [vmem:[%s3973_s27 + $0xa8] sm:$0xf]  ;;  %v2727_v37 = vld [vmem:[%s3973_s27 + $0xb0] sm:$0xf0]  ;;  %v2726_v38 = vld [vmem:[%s3973_s27 + $0xac] sm:$0xf] }
 0x24e   : > { %v2516_v39 = vor.u32 %v2727_v37, %v2515_v36  ;;  %v2517_v40 = vld [vmem:[%s3973_s27 + $0xb4] sm:$0xf0]  ;;  %v2503_v41 = vld [vmem:[%s3973_s27 + $0x90] sm:$0xf]  ;;  %v2724_v42 = vld [vmem:[%s3973_s27 + $0x98] sm:$0xf0] }
 0x24f   : > { %v2520_v43 = vor.u32 %v2726_v38, %v2517_v40  ;;  %v2723_v44 = vld [vmem:[%s3973_s27 + $0x94] sm:$0xf]  ;;  %v2505_v45 = vld [vmem:[%s3973_s27 + $0x9c] sm:$0xf0]  ;;  %v2504_v46 = vor.u32 %v2724_v42, %v2503_v41  ;;  %v2491_v48 = vld [vmem:[%s3973_s27 + $0x78] sm:$0xf] }
 0x250   : > { %1300 = vmatpush.bf16.msra.mxu0 %v2516_v39  ;;  %v2508_v47 = vor.u32 %v2723_v44, %v2505_v45  ;;  %v2721_v49 = vld [vmem:[%s3973_s27 + $0x80] sm:$0xf0]  ;;  %v2720_v50 = vld [vmem:[%s3973_s27 + $0x7c] sm:$0xf]  ;;  %v2493_v51 = vld [vmem:[%s3973_s27 + $0x84] sm:$0xf0] }
 0x251   : > { %1313 = vmatpush.bf16.msra.mxu1 %v2520_v43  ;;  %v2492_v52 = vor.u32 %v2721_v49, %v2491_v48  ;;  %v2496_v53 = vor.u32 %v2720_v50, %v2493_v51  ;;  %v2479_v54 = vld [vmem:[%s3973_s27 + $0x60] sm:$0xf]  ;;  %v2718_v55 = vld [vmem:[%s3973_s27 + $0x68] sm:$0xf0]  ;;  %v2717_v56 = vld [vmem:[%s3973_s27 + $0x64] sm:$0xf] }
 0x252   : > { %v2481_v57 = vld [vmem:[%s3973_s27 + $0x6c] sm:$0xf0]  ;;  %v2480_v58 = vor.u32 %v2718_v55, %v2479_v54  ;;  %v2728_v60 = vld [vmem:[%s3973_s27 + $0xb8] sm:$0xf0]  ;;  %v2511_v61 = vld [vmem:[%s3973_s27 + $0x98] sm:$0xf] }
 0x253   : > { %v2523_v59 = vld [vmem:[%s3973_s27 + $0xb0] sm:$0xf]  ;;  %v2484_v62 = vor.u32 %v2717_v56, %v2481_v57  ;;  %v2467_v63 = vld [vmem:[%s3973_s27 + $0x48] sm:$0xf]  ;;  %v2715_v0 = vld [vmem:[%s3973_s27 + $0x50] sm:$0xf0] }
 0x254   : > { %1301 = vmatpush.bf16.msra.mxu0 %v2504_v46  ;;  %v2524_v1 = vor.u32 %v2728_v60, %v2523_v59  ;;  %v2725_v2 = vld [vmem:[%s3973_s27 + $0xa0] sm:$0xf0]  ;;  %v2714_v3 = vld [vmem:[%s3973_s27 + $0x4c] sm:$0xf]  ;;  %v2469_v4 = vld [vmem:[%s3973_s27 + $0x54] sm:$0xf0]  ;;  %v2468_v6 = vor.u32 %v2715_v0, %v2467_v63 }
 0x255   : > { %1314 = vmatpush.bf16.msra.mxu1 %v2508_v47  ;;  %v2512_v5 = vor.u32 %v2725_v2, %v2511_v61  ;;  %v2455_v7 = vld [vmem:[%s3973_s27 + $0x30] sm:$0xf]  ;;  %v2499_v8 = vld [vmem:[%s3973_s27 + $0x80] sm:$0xf]  ;;  %v2722_v9 = vld [vmem:[%s3973_s27 + $0x88] sm:$0xf0]  ;;  %v2472_v10 = vor.u32 %v2714_v3, %v2469_v4 }
 0x256   : > { %1326 = vmatpush.bf16.msra.mxu2 %v2524_v1  ;;  %v2712_v11 = vld [vmem:[%s3973_s27 + $0x38] sm:$0xf0]  ;;  %v2711_v12 = vld [vmem:[%s3973_s27 + $0x34] sm:$0xf]  ;;  %v2457_v13 = vld [vmem:[%s3973_s27 + $0x3c] sm:$0xf0]  ;;  %v2500_v14 = vor.u32 %v2722_v9, %v2499_v8 }
 0x257   : > { %v2456_v15 = vor.u32 %v2712_v11, %v2455_v7  ;;  %v2487_v16 = vld [vmem:[%s3973_s27 + $0x68] sm:$0xf]  ;;  %v2719_v17 = vld [vmem:[%s3973_s27 + $0x70] sm:$0xf0]  ;;  %v2460_v18 = vor.u32 %v2711_v12, %v2457_v13  ;;  %v2443_v19 = vld [vmem:[%s3973_s27 + $0x18] sm:$0xf] }
 0x258   : > { %1302 = vmatpush.bf16.msra.mxu0 %v2492_v52  ;;  %v2709_v20 = vld [vmem:[%s3973_s27 + $0x20] sm:$0xf0]  ;;  %v2708_v21 = vld [vmem:[%s3973_s27 + $0x1c] sm:$0xf]  ;;  %v2445_v22 = vld [vmem:[%s3973_s27 + $0x24] sm:$0xf0]  ;;  %v2488_v23 = vor.u32 %v2719_v17, %v2487_v16 }
 0x259   : > { %1315 = vmatpush.bf16.msra.mxu1 %v2496_v53  ;;  %v2444_v24 = vor.u32 %v2709_v20, %v2443_v19  ;;  %v2475_v25 = vld [vmem:[%s3973_s27 + $0x50] sm:$0xf]  ;;  %v2716_v26 = vld [vmem:[%s3973_s27 + $0x58] sm:$0xf0]  ;;  %v2448_v27 = vor.u32 %v2708_v21, %v2445_v22  ;;  %v2431_v28 = vld [vmem:[%s3973_s27] sm:$0xf] }
 0x25a   : > { %1327 = vmatpush.bf16.msra.mxu2 %v2512_v5  ;;  %v2706_v29 = vld [vmem:[%s3973_s27 + $0x8] sm:$0xf0]  ;;  %v2705_v30 = vld [vmem:[%s3973_s27 + $0x4] sm:$0xf]  ;;  %v2433_v31 = vld [vmem:[%s3973_s27 + $0xc] sm:$0xf0]  ;;  %v2476_v32 = vor.u32 %v2716_v26, %v2475_v25 }
 0x25b   : > { %v2432_v33 = vor.u32 %v2706_v29, %v2431_v28  ;;  %v4102_v34 = vld [vmem:[#allocation2] sm:$0xff]  ;;  %v2713_v36 = vld [vmem:[%s3973_s27 + $0x40] sm:$0xf0]  ;;  %v2436_v37 = vor.u32 %v2705_v30, %v2433_v31  ;;  %v2451_v40 = vld [vmem:[%s3973_s27 + $0x20] sm:$0xf]  ;;  %vm1344_vm5 = vcmask 261120  }
 0x25c   : > { %1303 = vmatpush.bf16.msra.mxu0 %v2480_v58  ;;  %v2463_v35 = vld [vmem:[%s3973_s27 + $0x38] sm:$0xf]  ;;  %v1131_v38 = vpack.c.bf16 %v4102_v34, %v4102_v34  ;;  %v2710_v41 = vld [vmem:[%s3973_s27 + $0x28] sm:$0xf0]  ;;  %v2439_v43 = vld [vmem:[%s3973_s27 + $0x8] sm:$0xf] }
 0x25d   : > { %1316 = vmatpush.bf16.msra.mxu1 %v2484_v62  ;;  %v2464_v39 = vor.u32 %v2713_v36, %v2463_v35  ;;  %v2452_v42 = vor.u32 %v2710_v41, %v2451_v40  ;;  %v2707_v44 = vld [vmem:[%s3973_s27 + $0x10] sm:$0xf0]  ;;  %s3571_s4 = smov 64   ;;  %s3572_s5 = smov 96   ;;  %vm1380_vm6 = vcmask 1043456   ;;  %vm1364_vm7 = vcmask 64512  }
 0x25e   : > { %1328 = vmatpush.bf16.msra.mxu2 %v2500_v14  ;;  %v2440_v45 = vor.u32 %v2707_v44, %v2439_v43  ;;  %v1164_v46 = vld [vmem:[%s4046_s13] sm:$0x7]  ;;  %s3573_s10 = smov 32   ;;  %s4429_s29 = scalar_lea.vmem [#allocation6], %s3937_s25  ;;  %vm1587_vm8 = vcmask 523264   ;;  %vm1589_vm9 = vcmask 785408  }
 0x25f   : > { %v1166_v47 = vperm.slane %v1164_v46, 0  ;;  %v1167_v48 = vperm.slane %v1164_v46, 1  ;;  %v1168_v0 = vperm.slane %v1164_v46, 2  ;;  %v1343_v9 = vld [vmem:[%s4429_s29] sm:$0xff]  ;;  %s4430_s21 = scalar_lea.vmem [#allocation16], %s3970_s1  ;;  %s4431_s22 = scalar_lea.vmem [#allocation19], %s3970_s1 }
 0x260   : > { %1304 = vmatpush.bf16.msra.mxu0 %v2468_v6  ;;  %s4436_s11 = sld [smem:[#allocation39_spill]] }
 0x261   : > { %1317 = vmatpush.bf16.msra.mxu1 %v2472_v10 }
 0x262   : > { %1329 = vmatpush.bf16.msra.mxu2 %v2488_v23 }
 0x264   : > { %1305 = vmatpush.bf16.msra.mxu0 %v2456_v15 }
 0x265   : > { %1318 = vmatpush.bf16.msra.mxu1 %v2460_v18 }
 0x266   : > { %1330 = vmatpush.bf16.msra.mxu2 %v2476_v32  ;;  %p2693_p9 = scmp.ne.s32.totalorder %s4436_s11, 1 }
 0x268   : > { %1306 = vmatpush.bf16.msra.mxu0 %v2444_v24 }
 0x269   : > { %1319 = vmatpush.bf16.msra.mxu1 %v2448_v27 }
 0x26a   : > { %1331 = vmatpush.bf16.msra.mxu2 %v2464_v39 }
 0x26c   : > { %1307 = vmatpush.bf16.msra.mxu0 %v2432_v33 }
 0x26d   : > { %1320 = vmatpush.bf16.msra.mxu1 %v2436_v37 }
 0x26e   : > { %1332 = vmatpush.bf16.msra.mxu2 %v2452_v42 }
 0x26f   : > { %1308 = vmatmul.bf16.vlgmr.msra.gmra.mxu0 %v1131_v38 }
 0x270   : > { %1321 = vmatmul.bf16.vlgmr.msra.gmra.mxu1 %v1131_v38 }
 0x272   : > { %1333 = vmatpush.bf16.msra.mxu2 %v2440_v45 }
 0x275   : > { %1334 = vmatmul.bf16.vlgmr.msra.gmra.mxu2 %v1131_v38 }
 0x2ec   : > { %v1309_v49 = vpop.f32.mrf.mxu0 }
 0x2ed   : > { %v1310_v50 = vadd.f32 %v1309_v49, %v1166_v47  ;;  %v1322_v51 = vpop.f32.mrf.mxu1 }
 0x2ee   : > { %v1323_v52 = vadd.f32 %v1322_v51, %v1167_v48 }
 0x2ef   : > { %v1339_v53 = vmul.f32 0.17677669, %v1310_v50 }
 0x2f0   : > { %v1341_v54 = vpack.c.bf16 %v1323_v52, %v1323_v52 }
 0x2f1   : > { %v1340_v55 = vpack.c.bf16 %v1339_v53, %v1339_v53 }
 0x2f2   : > { %v1403_v56 = vunpack.c.l.b16 %v1341_v54  ;;  %v1349_v57 = vsel %vm1344_vm5, %v1341_v54, 0 }
 0x2f3   : > { %1358 = vmatpush.bf16.xpose.msra.mxu3 %v1349_v57  ;;  %v1398_v61 = vunpack.c.l.b16 %v1340_v55 }
 0x2f4   : > { %v1404_v58 = vpack.c.b16 %v1403_v56, %v1403_v56  ;;  %v1311_v59 = vpop.f32.mrf.mxu0 }
 0x2f5   : > { %v1324_v60 = vpop.f32.mrf.mxu1  ;;  %v1399_v62 = vpack.c.b16 %v1398_v61, %v1398_v61 }
 0x2f6   : > { %1464 = vrot.lane.b32.xlu2 %v1404_v58, %s3571_s4  ;;  %1405 = vrot.lane.b32.xlu1 %v1404_v58, %s3572_s5 }
 0x2f8   : > { %v1335_v63 = vpop.f32.mrf.mxu2 }
 0x2f9   : > { %v1336_v1 = vadd.f32 %v1335_v63, %v1168_v0 }
 0x2fa   : > { %2525 = vmatmul.msk.bf16.vlgmr.msra.gmra.mxu3 %vm1344_vm5, %v1340_v55 }
 0x2fb   : > { %v1342_v3 = vpack.c.bf16 %v1336_v1, %v1336_v1 }
 0x2fd   : > { %v1382_v4 = vsel %vm1380_vm6, %v1342_v3, 0  ;;  %v1439_v43 = vunpack.c.l.b16 %v1342_v3 }
 0x2fe   : > { %1520 = vrot.lane.b32.xlu2 %v1404_v58, %s3573_s10  ;;  %1400 = vrot.lane.b32.xlu1 %v1399_v62, %s3572_s5 }
 0x2ff   : > { %1391 = vmatpush.bf16.msrb.mxu3 %v1382_v4  ;;  %v1440_v44 = vpack.c.b16 %v1439_v43, %v1439_v43  ;;  %v2623_v43 = vld [vmem:[%s3998_s19 + $0x70] sm:$0xf] }
 0x300   : > { %v1337_v2 = vpop.f32.mrf.mxu2 }
 0x306   : > { %1518 = vrot.lane.b32.xlu1 %v1399_v62, %s3573_s10 }
 0x350   : > { %v1465_v5 = vpop.permute.xlu2 %1464 }
 0x351   : > { %v1470_v6 = vsel %vm1344_vm5, %v1465_v5, 0 }
 0x352   : > { %1479 = vmatpush.bf16.xpose.msrb.mxu2 %v1470_v6 }
 0x358   : > { %v1521_v22 = vpop.permute.xlu2 %1520 }
 0x359   : > { %v1526_v24 = vsel %vm1344_vm5, %v1521_v22, 0  ;;  %v2734_v22 = vld [vmem:[%s3982_s20 + $0x28] sm:$0xff] }
 0x368   : > { %v1406_v7 = vpop.permute.xlu1 %1405 }
 0x369   : > { %v1411_v8 = vsel %vm1344_vm5, %v1406_v7, 0 }
 0x36a   : > { %1420 = vmatpush.bf16.xpose.msra.mxu3 %v1411_v8 }
 0x370   : > { %v1401_v26 = vpop.permute.xlu1 %1400 }
 0x378   : > { %v1519_v27 = vpop.permute.xlu1 %1518 }
 0x37d   : > { %v1360_v10 = vpop.f32.mrf.mxu3 }
 0x37e   : > { %v1361_v11 = vadd.f32 %v1360_v10, %v1343_v9 }
 0x380   : > { %v1365_v12 = vsel %vm1364_vm7, %v1361_v11, -inf }
 0x381   : > { %1366 = vmax.xlane.f32.xlu0 %v1365_v12 }
 0x385   : > { %v1362_v13 = vpop.f32.mrf.mxu3 }
 0x3f4   : > { %v1367_v14 = vpop.xlane.xlu0 %1366 }
 0x3f5   : > { %v1368_v15 = vsub.f32 %v1361_v11, %v1367_v14 }
 0x3f7   : > { %v1369_v16 = vmul.f32 1.442695, %v1368_v15 }
 0x3f9   : > { %2980 = vpow2.f32 %v1369_v16 }
 0x3ff   : > { %v2981_v17 = vpop.eup %2980 }
 0x400   : > { %v1371_v18 = vsel %vm1364_vm7, %v2981_v17, 0.0 }
 0x401   : > { %1372 = vadd.xlane.f32.xlu0 %v1371_v18 }
 0x415   : > { %1462 = vrot.lane.b32.xlu0 %v1399_v62, %s3571_s4 }
 0x474   : > { %v1373_v19 = vpop.xlane.xlu0 %1372 }
 0x475   : > { %2982 = vrcp.f32 %v1373_v19 }
 0x47b   : > { %v2983_v20 = vpop.eup %2982 }
 0x47c   : > { %v1375_v21 = vmul.f32 %v2983_v20, %v2981_v17  ;;  %v2736_v20 = vld [vmem:[%s3982_s20 + $0x38] sm:$0xff] }
 0x47d   : > { %1660 = vmatpush.bf16.msrb.mxu1 %v2736_v20 }
 0x47e   : > { %v1376_v23 = vpack.c.bf16 %v1375_v21, %v1375_v21  ;;  %v2735_v21 = vld [vmem:[%s3982_s20 + $0x30] sm:$0xff] }
 0x480   : > { %2526 = vmatmul.msk.bf16.vlgmr.msrb.gmra.mxu3 %vm1364_vm7, %v1376_v23  ;;  %v2733_v23 = vld [vmem:[%s3982_s20 + $0x20] sm:$0xff] }
 0x481   : > { %1535 = vmatpush.bf16.xpose.msrb.mxu3 %v1526_v24  ;;  %1661 = vmatpush.bf16.msrb.mxu1 %v2735_v21  ;;  %v2732_v24 = vld [vmem:[%s3982_s20 + $0x18] sm:$0xff]  ;;  %v2585_v21 = vld [vmem:[%s3998_s19 + $0x28] sm:$0xf0] }
 0x485   : > { %1662 = vmatpush.bf16.msrb.mxu1 %v2734_v22 }
 0x487   : > { %v1463_v25 = vpop.permute.xlu0 %1462 }
 0x488   : > { %2529 = vmatmul.msk.bf16.vlgmr.msrb.gmra.mxu2 %vm1344_vm5, %v1463_v25  ;;  %v2731_v25 = vld [vmem:[%s3982_s20 + $0x10] sm:$0xff] }
 0x489   : > { %1663 = vmatpush.bf16.msrb.mxu1 %v2733_v23  ;;  %v2575_v23 = vld [vmem:[%s3998_s19 + $0x10] sm:$0xf] }
 0x48d   : > { %1664 = vmatpush.bf16.msrb.mxu1 %v2732_v24  ;;  %v2740_v24 = vld [vmem:[%s3998_s19 + $0x14] sm:$0xf0] }
 0x490   : > { %2527 = vmatmul.msk.bf16.vlgmr.msra.gmra.mxu3 %vm1344_vm5, %v1401_v26  ;;  %v2730_v26 = vld [vmem:[%s3982_s20 + $0x8] sm:$0xff] }
 0x491   : > { %1665 = vmatpush.bf16.msrb.mxu1 %v2731_v25  ;;  %v2739_v25 = vld [vmem:[%s3998_s19 + $0x14] sm:$0xf] }
 0x495   : > { %1666 = vmatpush.bf16.msrb.mxu1 %v2730_v26  ;;  %v2576_v26 = vor.u32 %v2740_v24, %v2575_v23 }
 0x4a0   : > { %2531 = vmatmul.msk.bf16.vlgmr.msrb.gmra.mxu3 %vm1344_vm5, %v1519_v27  ;;  %v2729_v27 = vld [vmem:[%s3982_s20] sm:$0xff] }
 0x4a1   : > { %1667 = vmatpush.bf16.msrb.mxu1 %v2729_v27  ;;  %v2577_v27 = vld [vmem:[%s3998_s19 + $0x18] sm:$0xf0] }
 0x503   : > { %v4133_v28 = vpop.f32.mrf.mxu3 }
 0x50b   : > { %v1395_v29 = vpop.f32.mrf.mxu3  ;;  %v1481_v30 = vpop.f32.mrf.mxu2 }
 0x50c   : > { %v1482_v31 = vadd.f32 %v1481_v30, %v1343_v9 }
 0x50e   : > { %v1485_v32 = vsel %vm1364_vm7, %v1482_v31, -inf }
 0x50f   : > { %1486 = vmax.xlane.f32.xlu1 %v1485_v32 }
 0x513   : > { %v1422_v33 = vpop.f32.mrf.mxu3  ;;  %v1483_v35 = vpop.f32.mrf.mxu2 }
 0x514   : > { %v1423_v36 = vadd.f32 %v1422_v33, %v1343_v9 }
 0x516   : > { %v1426_v37 = vsel %vm1364_vm7, %v1423_v36, -inf }
 0x517   : > { %1427 = vmax.xlane.f32.xlu2 %v1426_v37  ;;  %v2974_v37 = vld [vmem:[%s4430_s21] ss:$0 sm:$0xff] }
 0x51b   : > { %v1424_v38 = vpop.f32.mrf.mxu3 }
 0x523   : > { %v1537_v39 = vpop.f32.mrf.mxu3 }
 0x524   : > { %v1538_v40 = vadd.f32 %v1537_v39, %v1343_v9 }
 0x526   : > { %v1541_v41 = vsel %vm1364_vm7, %v1538_v40, -inf }
 0x527   : > { %1542 = vmax.xlane.f32.xlu0 %v1541_v41 }
 0x52b   : > { %v1539_v42 = vpop.f32.mrf.mxu3 }
 0x52c   : > { %v3574_v42 = vmov 128.0  }
 0x53b   : > { %1497 = vrot.lane.b32.xlu0 %v1440_v44, %s3571_s4 }
 0x582   : > { %v1487_v45 = vpop.xlane.xlu1 %1486 }
 0x583   : > { %v1488_v46 = vsub.f32 %v1482_v31, %v1487_v45 }
 0x585   : > { %v1489_v47 = vmul.f32 1.442695, %v1488_v46  ;;  %v2625_v46 = vld [vmem:[%s3998_s19 + $0x78] sm:$0xf0] }
 0x587   : > { %2984 = vpow2.f32 %v1489_v47 }
 0x58a   : > { %v1428_v48 = vpop.xlane.xlu2 %1427 }
 0x58b   : > { %v1429_v49 = vsub.f32 %v1423_v36, %v1428_v48 }
 0x58d   : > { %v2985_v50 = vpop.eup %2984  ;;  %v1430_v51 = vmul.f32 1.442695, %v1429_v49 }
 0x58e   : > { %v1491_v52 = vsel %vm1364_vm7, %v2985_v50, 0.0 }
 0x58f   : > { %2986 = vpow2.f32 %v1430_v51  ;;  %1492 = vadd.xlane.f32.xlu1 %v1491_v52 }
 0x595   : > { %v2987_v53 = vpop.eup %2986 }
 0x596   : > { %v1432_v54 = vsel %vm1364_vm7, %v2987_v53, 0.0 }
 0x597   : > { %1433 = vadd.xlane.f32.xlu2 %v1432_v54 }
 0x59a   : > { %v1543_v55 = vpop.xlane.xlu0 %1542 }
 0x59b   : > { %v1544_v56 = vsub.f32 %v1538_v40, %v1543_v55 }
 0x59d   : > { %v1545_v57 = vmul.f32 1.442695, %v1544_v56 }
 0x59f   : > { %2988 = vpow2.f32 %v1545_v57  ;;  %v2615_v57 = vld [vmem:[%s3998_s19 + $0x60] sm:$0xf] }
 0x5a5   : > { %v2989_v58 = vpop.eup %2988 }
 0x5a6   : > { %v1547_v59 = vsel %vm1364_vm7, %v2989_v58, 0.0 }
 0x5a7   : > { %1548 = vadd.xlane.f32.xlu1 %v1547_v59  ;;  %v2749_v59 = vld [vmem:[%s3998_s19 + $0x64] sm:$0xf] }
 0x5ad   : > { %v1498_v60 = vpop.permute.xlu0 %1497 }
 0x5ae   : > { %v1503_v61 = vsel %vm1380_vm6, %v1498_v60, 0 }
 0x5af   : > { %1441 = vrot.lane.b32.xlu2 %v1440_v44, %s3572_s5  ;;  %1512 = vmatpush.bf16.msra.mxu2 %v1503_v61  ;;  %v2617_v61 = vld [vmem:[%s3998_s19 + $0x68] sm:$0xf0] }
 0x5c0   : > { %1553 = vrot.lane.b32.xlu1 %v1440_v44, %s3573_s10  ;;  %v2752_v44 = vld [vmem:[%s3998_s19 + $0x74] sm:$0xf0] }
 0x5c1   : > { %v2624_v45 = vor.u32 %v2752_v44, %v2623_v43  ;;  %v2758_v44 = vld [vmem:[%s4006_s9 + $0x28] sm:$0xff] }
 0x5c3   : > { %1814 = vmatpush.bf16.msrb.mxu2 %v2624_v45  ;;  %v2757_v45 = vld [vmem:[%s4006_s9 + $0x20] sm:$0xff] }
 0x602   : > { %v1493_v62 = vpop.xlane.xlu1 %1492 }
 0x603   : > { %2990 = vrcp.f32 %v1493_v62  ;;  %v2620_v62 = vor.u32 %v2749_v59, %v2617_v61  ;;  %v2976_v61 = vld [vmem:[%s1028_s12] ss:$0 sm:$0xff] }
 0x609   : > { %v2991_v63 = vpop.eup %2990 }
 0x60a   : > { %v1495_v0 = vmul.f32 %v2991_v63, %v2985_v50  ;;  %v1434_v1 = vpop.xlane.xlu2 %1433  ;;  %v2607_v63 = vld [vmem:[%s3998_s19 + $0x50] sm:$0xf] }
 0x60b   : > { %2992 = vrcp.f32 %v1434_v1  ;;  %v2747_v1 = vld [vmem:[%s3998_s19 + $0x54] sm:$0xf] }
 0x60c   : > { %v1496_v2 = vpack.c.bf16 %v1495_v0, %v1495_v0  ;;  %v2748_v0 = vld [vmem:[%s3998_s19 + $0x54] sm:$0xf0] }
 0x60e   : > { %2530 = vmatmul.msk.bf16.vlgmr.msra.gmra.mxu2 %vm1364_vm7, %v1496_v2  ;;  %v2608_v2 = vor.u32 %v2748_v0, %v2607_v63 }
 0x611   : > { %v2993_v3 = vpop.eup %2992 }
 0x612   : > { %v1436_v4 = vmul.f32 %v2993_v3, %v2987_v53  ;;  %v1442_v5 = vpop.permute.xlu2 %1441  ;;  %v2609_v3 = vld [vmem:[%s3998_s19 + $0x58] sm:$0xf0] }
 0x613   : > { %v1447_v6 = vsel %vm1380_vm6, %v1442_v5, 0  ;;  %v2599_v5 = vld [vmem:[%s3998_s19 + $0x40] sm:$0xf] }
 0x614   : > { %1456 = vmatpush.bf16.msrb.mxu0 %v1447_v6  ;;  %v1437_v7 = vpack.c.bf16 %v1436_v4, %v1436_v4  ;;  %v2612_v4 = vor.u32 %v2747_v1, %v2609_v3  ;;  %v2746_v6 = vld [vmem:[%s3998_s19 + $0x44] sm:$0xf0]  ;;  %v2753_v3 = vld [vmem:[%s4006_s9] sm:$0xff] }
 0x615   : > { %v2754_v1 = vld [vmem:[%s4006_s9 + $0x8] sm:$0xff] }
 0x617   : > { %2528 = vmatmul.msk.bf16.vlgmr.msrb.gmra.mxu0 %vm1364_vm7, %v1437_v7  ;;  %v2745_v7 = vld [vmem:[%s3998_s19 + $0x44] sm:$0xf] }
 0x61a   : > { %v1549_v8 = vpop.xlane.xlu1 %1548 }
 0x61b   : > { %2994 = vrcp.f32 %v1549_v8  ;;  %v2600_v8 = vor.u32 %v2746_v6, %v2599_v5 }
 0x61c   : > { %2996 = vrcp.f32 %v3574_v42  ;;  %v2767_v42 = vld [vmem:[%s4006_s9 + $0x70] sm:$0xff] }
 0x621   : > { %v2995_v9 = vpop.eup %2994 }
 0x622   : > { %v1551_v10 = vmul.f32 %v2995_v9, %v2989_v58  ;;  %v2997_v48 = vpop.eup %2996  ;;  %v2750_v58 = vld [vmem:[%s3998_s19 + $0x64] sm:$0xf0]  ;;  %v2601_v9 = vld [vmem:[%s3998_s19 + $0x48] sm:$0xf0] }
 0x623   : > { %v1679_v49 = vmul.f32 128.0, %v2997_v48  ;;  %vm1683_vm10 = vweird.f32 %v2997_v48  ;;  %v2616_v60 = vor.u32 %v2750_v58, %v2615_v57  ;;  %v2975_v58 = vld [vmem:[%s4431_s22] ss:$0 sm:$0xff] }
 0x624   : > { %v1552_v13 = vpack.c.bf16 %v1551_v10, %v1551_v10  ;;  %v2604_v10 = vor.u32 %v2745_v7, %v2601_v9 }
 0x625   : > { %v1680_v50 = vsub.f32 1.0, %v1679_v49  ;;  %1815 = vmatpush.bf16.msrb.mxu2 %v2616_v60  ;;  %v2756_v49 = vld [vmem:[%s4006_s9 + $0x18] sm:$0xff] }
 0x629   : > { %1816 = vmatpush.bf16.msrb.mxu2 %v2608_v2  ;;  %v2762_v2 = vld [vmem:[%s4006_s9 + $0x48] sm:$0xff] }
 0x62d   : > { %1817 = vmatpush.bf16.msrb.mxu2 %v2600_v8 }
 0x632   : > { %v1554_v11 = vpop.permute.xlu1 %1553 }
 0x633   : > { %v1559_v12 = vsel %vm1380_vm6, %v1554_v11, 0  ;;  %v2591_v11 = vld [vmem:[%s3998_s19 + $0x30] sm:$0xf] }
 0x634   : > { %1568 = vmatpush.bf16.msra.mxu0 %v1559_v12  ;;  %v2744_v12 = vld [vmem:[%s3998_s19 + $0x34] sm:$0xf0] }
 0x637   : > { %2532 = vmatmul.msk.bf16.vlgmr.msra.gmra.mxu0 %vm1364_vm7, %v1552_v13  ;;  %v2743_v13 = vld [vmem:[%s3998_s19 + $0x34] sm:$0xf] }
 0x691   : > { %v1514_v14 = vpop.f32.mrf.mxu2 }
 0x694   : > { %v1458_v15 = vpop.f32.mrf.mxu0 }
 0x695   : > { %1575 = vrot.lane.b32.xlu2 %v1458_v15, %s3573_s10  ;;  %v2593_v15 = vld [vmem:[%s3998_s19 + $0x38] sm:$0xf0] }
 0x699   : > { %v1516_v16 = vpop.f32.mrf.mxu2 }
 0x69a   : > { %v2596_v16 = vor.u32 %v2743_v13, %v2593_v15 }
 0x69c   : > { %v1460_v17 = vpop.f32.mrf.mxu0 }
 0x69d   : > { %1579 = vrot.lane.b32.xlu2 %v1514_v14, %s3571_s4  ;;  %v2592_v14 = vor.u32 %v2744_v12, %v2591_v11  ;;  %v2583_v17 = vld [vmem:[%s3998_s19 + $0x20] sm:$0xf] }
 0x69f   : > { %1818 = vmatpush.bf16.msrb.mxu2 %v2592_v14 }
 0x6b4   : > { %v1570_v18 = vpop.f32.mrf.mxu0 }
 0x6b5   : > { %1583 = vrot.lane.b32.xlu0 %v1570_v18, %s3572_s5  ;;  %v2742_v18 = vld [vmem:[%s3998_s19 + $0x24] sm:$0xf0] }
 0x6b6   : > { %v2584_v20 = vor.u32 %v2742_v18, %v2583_v17  ;;  %v2977_v17 = vld [vmem:[%s1025_s24] ss:$0 sm:$0xff] }
 0x6b8   : > { %1819 = vmatpush.bf16.msrb.mxu2 %v2584_v20 }
 0x6bc   : > { %v1572_v19 = vpop.f32.mrf.mxu0  ;;  %1820 = vmatpush.bf16.msrb.mxu2 %v2576_v26 }
 0x6bd   : > { %v2741_v19 = vld [vmem:[%s3998_s19 + $0x24] sm:$0xf] }
 0x6be   : > { %v2588_v22 = vor.u32 %v2741_v19, %v2585_v21 }
 0x6ef   : > { %v1576_v29 = vpop.permute.xlu2 %1575 }
 0x6f0   : > { %v1586_v31 = vsel %vm1344_vm5, %v4133_v28, %v1576_v29  ;;  %v2751_v28 = vld [vmem:[%s3998_s19 + $0x74] sm:$0xf]  ;;  %v2567_v29 = vld [vmem:[%s3998_s19] sm:$0xf] }
 0x6f1   : > { %v2628_v47 = vor.u32 %v2751_v28, %v2625_v46  ;;  %v2766_v28 = vld [vmem:[%s4006_s9 + $0x68] sm:$0xff]  ;;  %v2765_v46 = vld [vmem:[%s4006_s9 + $0x60] sm:$0xff] }
 0x6f3   : > { %1827 = vmatpush.bf16.msra.mxu3 %v2628_v47 }
 0x6f7   : > { %v1580_v30 = vpop.permute.xlu2 %1579  ;;  %1828 = vmatpush.bf16.msra.mxu3 %v2620_v62 }
 0x6f8   : > { %v1588_v32 = vsel %vm1587_vm8, %v1586_v31, %v1580_v30  ;;  %v2738_v30 = vld [vmem:[%s3998_s19 + $0x4] sm:$0xf0]  ;;  %v2580_v31 = vor.u32 %v2739_v25, %v2577_v27 }
 0x6fb   : > { %1829 = vmatpush.bf16.msra.mxu3 %v2612_v4  ;;  %v2761_v4 = vld [vmem:[%s4006_s9 + $0x40] sm:$0xff] }
 0x6ff   : > { %1830 = vmatpush.bf16.msra.mxu3 %v2604_v10 }
 0x703   : > { %1831 = vmatpush.bf16.msra.mxu3 %v2596_v16 }
 0x707   : > { %1832 = vmatpush.bf16.msra.mxu3 %v2588_v22 }
 0x70b   : > { %1833 = vmatpush.bf16.msra.mxu3 %v2580_v31 }
 0x727   : > { %v1584_v33 = vpop.permute.xlu0 %1583 }
 0x728   : > { %v1590_v35 = vsel %vm1589_vm9, %v1588_v32, %v1584_v33  ;;  %v2737_v32 = vld [vmem:[%s3998_s19 + $0x4] sm:$0xf]  ;;  %v2569_v33 = vld [vmem:[%s3998_s19 + $0x8] sm:$0xf0]  ;;  %s4434_s19 = scalar_lea.vmem [#allocation20], %s3970_s1 }
 0x729   : > { %v1591_v36 = vpack.c.bf16 %v1590_v35, %v1590_v35  ;;  %v2568_v35 = vor.u32 %v2738_v30, %v2567_v29 }
 0x72b   : > { %1668 = vmatmul.bf16.vlgmr.msrb.gmra.mxu1 %v1591_v36  ;;  %v2572_v36 = vor.u32 %v2737_v32, %v2569_v33  ;;  %1821 = vmatpush.bf16.msrb.mxu2 %v2568_v35 }
 0x72d   : > { %1834 = vmatpush.bf16.msra.mxu3 %v2572_v36 }
 0x7a8   : > { %v1669_v38 = vpop.f32.mrf.mxu1 }
 0x7a9   : > { %v1670_v39 = vadd.f32 %v2974_v37, %v1669_v38  ;;  %v2760_v37 = vld [vmem:[%s4006_s9 + $0x38] sm:$0xff] }
 0x7aa   : > { %v2768_v38 = vld [vmem:[%s4006_s9 + $0x78] sm:$0xff]  ;;  %1976 = vmatpush.bf16.msrb.mxu0 %v2760_v37 }
 0x7ab   : > { %v1673_v40 = vadd.f32 %v1670_v39, %v4102_v34  ;;  %v1681_v34 = vmul.f32 %v2997_v48, %v1680_v50  ;;  %1989 = vmatpush.bf16.msra.mxu1 %v2768_v38  ;;  %v2764_v50 = vld [vmem:[%s4006_s9 + $0x58] sm:$0xff] }
 0x7ad   : > { %1676 = vadd.xlane.f32.xlu2 %v1673_v40  ;;  %v1682_v51 = vadd.f32 %v2997_v48, %v1681_v34 }
 0x7af   : > { %v4170_v52 = vsel %vm1683_vm10, %v2997_v48, %v1682_v51  ;;  %1990 = vmatpush.bf16.msra.mxu1 %v2767_v42  ;;  %v2979_v42 = vld [vmem:[%s1031_s2] ss:$0 sm:$0xff] }
 0x7b0   : > { %v1671_v41 = vpop.f32.mrf.mxu1 }
 0x7b1   : > { %v2759_v41 = vld [vmem:[%s4006_s9 + $0x30] sm:$0xff] }
 0x7b2   : > { %1977 = vmatpush.bf16.msrb.mxu0 %v2759_v41 }
 0x7b3   : > { %1991 = vmatpush.bf16.msra.mxu1 %v2766_v28 }
 0x7b6   : > { %1978 = vmatpush.bf16.msrb.mxu0 %v2758_v44 }
 0x7b7   : > { %1992 = vmatpush.bf16.msra.mxu1 %v2765_v46 }
 0x7ba   : > { %1979 = vmatpush.bf16.msrb.mxu0 %v2757_v45 }
 0x7bb   : > { %1993 = vmatpush.bf16.msra.mxu1 %v2764_v50 }
 0x7be   : > { %1980 = vmatpush.bf16.msrb.mxu0 %v2756_v49 }
 0x820   : > { %v1677_v53 = vpop.xlane.xlu2 %1676 }
 0x821   : > { %v1685_v54 = vmul.f32 %v4170_v52, %v1677_v53  ;;  %v2755_v53 = vld [vmem:[%s4006_s9 + $0x10] sm:$0xff] }
 0x822   : > { %1981 = vmatpush.bf16.msrb.mxu0 %v2755_v53 }
 0x823   : > { %v4173_v55 = vsub.f32 %v1673_v40, %v1685_v54  ;;  %v2763_v54 = vld [vmem:[%s4006_s9 + $0x50] sm:$0xff] }
 0x824   : > { %1994 = vmatpush.bf16.msra.mxu1 %v2763_v54 }
 0x825   : > { %v1687_v56 = vmul.f32 %v4173_v55, %v4173_v55 }
 0x826   : > { %1982 = vmatpush.bf16.msrb.mxu0 %v2754_v1 }
 0x827   : > { %1688 = vadd.xlane.f32.xlu0 %v1687_v56 }
 0x828   : > { %1995 = vmatpush.bf16.msra.mxu1 %v2762_v2 }
 0x82a   : > { %1983 = vmatpush.bf16.msrb.mxu0 %v2753_v3 }
 0x82c   : > { %1996 = vmatpush.bf16.msra.mxu1 %v2761_v4 }
 0x89a   : > { %v1689_v39 = vpop.xlane.xlu0 %1688 }
 0x89b   : > { %v1690_v40 = vmul.f32 %v1689_v39, %v4170_v52 }
 0x89d   : > { %v1691_v43 = vadd.f32 1e-05, %v1690_v40  ;;  %v2978_v40 = vld [vmem:[%s4434_s19] ss:$0 sm:$0xff] }
 0x89f   : > { %2998 = vrsqrt.f32 %v1691_v43  ;;  %vm1698_vm12 = vweird.f32 %v1691_v43 }
 0x8a5   : > { %v2999_v47 = vpop.eup %2998 }
 0x8a6   : > { %v1693_v48 = vmul.f32 %v2999_v47, %v1691_v43  ;;  %vm1699_vm11 = vweird.f32 %v2999_v47 }
 0x8a7   : > { %vm1700_vm13 = vmor %vm1698_vm12, %vm1699_vm11 }
 0x8a8   : > { %v1694_v34 = vmul.f32 %v2999_v47, %v1693_v48 }
 0x8aa   : > { %v1695_v51 = vmul.f32 0.5, %v1694_v34 }
 0x8ac   : > { %v1696_v56 = vsub.f32 1.5, %v1695_v51 }
 0x8ae   : > { %v1697_v57 = vmul.f32 %v2999_v47, %v1696_v56 }
 0x8b0   : > { %v1701_v59 = vsel %vm1700_vm13, %v2999_v47, %v1697_v57 }
 0x8b1   : > { %v1702_v60 = vmul.f32 %v1701_v59, %v4173_v55  ;;  %v1728_v55 = vld [vmem:[%s4037_s3] sm:$0x3] }
 0x8b2   : > { %v1730_v5 = vperm.slane %v1728_v55, 0  ;;  %v1731_v6 = vperm.slane %v1728_v55, 1 }
 0x8b3   : > { %v1706_v62 = vmul.f32 %v2975_v58, %v1702_v60 }
 0x8b5   : > { %v1710_v63 = vadd.f32 %v2976_v61, %v1706_v62 }
 0x8b7   : > { %v1711_v0 = vpack.c.bf16 %v1710_v63, %v1710_v63 }
 0x8b9   : > { %1822 = vmatmul.bf16.vlgmr.msrb.gmra.mxu2 %v1711_v0  ;;  %1835 = vmatmul.bf16.vlgmr.msra.gmra.mxu3 %v1711_v0 }
 0x93c   : > { %v1823_v7 = vpop.f32.mrf.mxu2  ;;  %v1836_v8 = vpop.f32.mrf.mxu3 }
 0x93d   : > { %v1824_v9 = vadd.f32 %v1823_v7, %v1730_v5  ;;  %v1837_v10 = vadd.f32 %v1836_v8, %v1731_v6 }
 0x93f   : > { %v1840_v11 = vmax.f32 %v1824_v9, 0.0  ;;  %v1841_v12 = vmax.f32 %v1837_v10, 0.0 }
 0x941   : > { %v1842_v13 = vpack.c.bf16 %v1840_v11, %v1840_v11  ;;  %v1843_v14 = vpack.c.bf16 %v1841_v12, %v1841_v12 }
 0x943   : > { %1984 = vmatmul.bf16.vlgmr.msrb.gmra.mxu0 %v1842_v13  ;;  %1997 = vmatmul.bf16.vlgmr.msra.gmra.mxu1 %v1843_v14 }
 0x944   : > { %v1825_v15 = vpop.f32.mrf.mxu2  ;;  %v1838_v16 = vpop.f32.mrf.mxu3 }
 0x9c0   : > { %v1985_v18 = vpop.f32.mrf.mxu0  ;;  %v1998_v19 = vpop.f32.mrf.mxu1 }
 0x9c1   : > { %v1986_v20 = vadd.f32 %v2977_v17, %v1985_v18 }
 0x9c3   : > { %v1999_v21 = vadd.f32 %v1998_v19, %v1986_v20 }
 0x9c5   : > { %v2002_v22 = vadd.f32 %v1999_v21, %v1710_v63 }
 0x9c7   : > { %2005 = vadd.xlane.f32.xlu1 %v2002_v22 }
 0x9c8   : > { %v1987_v23 = vpop.f32.mrf.mxu0  ;;  %v2000_v24 = vpop.f32.mrf.mxu1 }
 0xa3a   : > { %v2006_v25 = vpop.xlane.xlu1 %2005 }
 0xa3b   : > { %v2007_v26 = vmul.f32 %v2006_v25, %v4170_v52 }
 0xa3d   : > { %v2008_v27 = vsub.f32 %v2002_v22, %v2007_v26 }
 0xa3f   : > { %v2009_v29 = vmul.f32 %v2008_v27, %v2008_v27 }
 0xa41   : > { %2010 = vadd.xlane.f32.xlu2 %v2009_v29 }
 0xab4   : > { %v2011_v30 = vpop.xlane.xlu2 %2010 }
 0xab5   : > { %v2012_v31 = vmul.f32 %v2011_v30, %v4170_v52 }
 0xab7   : > { %v2013_v32 = vadd.f32 1e-05, %v2012_v31 }
 0xab9   : > { %3000 = vrsqrt.f32 %v2013_v32  ;;  %vm2020_vm15 = vweird.f32 %v2013_v32 }
 0xabf   : > { %v3001_v33 = vpop.eup %3000 }
 0xac0   : > { %v2015_v35 = vmul.f32 %v3001_v33, %v2013_v32  ;;  %vm2021_vm14 = vweird.f32 %v3001_v33 }
 0xac1   : > { %vm2022_vm0 = vmor %vm2020_vm15, %vm2021_vm14 }
 0xac2   : > { %v2016_v36 = vmul.f32 %v3001_v33, %v2015_v35 }
 0xac4   : > { %v2017_v37 = vmul.f32 0.5, %v2016_v36 }
 0xac6   : > { %v2018_v38 = vsub.f32 1.5, %v2017_v37 }
 0xac8   : > { %v2019_v39 = vmul.f32 %v3001_v33, %v2018_v38 }
 0xaca   : > { %v2023_v41 = vsel %vm2022_vm0, %v3001_v33, %v2019_v39 }
 0xacb   : > { %v2024_v52 = vmul.f32 %v2023_v41, %v2008_v27 }
 0xacd   : > { %v2028_v43 = vmul.f32 %v2978_v40, %v2024_v52  ;;  %2037 = sbr.rel (%p2693_p9) target bundleno = 2778 (0xada), region = 152 }
 0xacf   : > { %v2032_v44 = vadd.f32 %v2979_v42, %v2028_v43 }
 0xad1   : > { %2033 = vst [vmem:[#allocation2] sm:$0xff] %v2032_v44 }
 0xad8   : > { %v2038_v28 = vld [vmem:[#allocation2] sm:$0xff] }
 0xad9   : > { %2039 = vst [vmem:[%s1014_s7] sm:$0xff] %v2038_v28 }
 0xada PF: > { %s4437_s1 = sld [smem:[#allocation40_spill]]  ;;  %s2053_s14 = sshll.u32 %s1014_s7, 4  ;;  %s2054_s14 = int_to_ptr.vmem [resolvable:$true] %s2053_s14 }
 0xadb   : > { %s4439_s2 = sld [smem:[#allocation72_spill]]  ;;  %s4441_s30 = sand.u32 1, %s3534_s0  }
 0xadc   : > { %s2041_s4 = scalar_lea.sflag [#allocation5], %s4441_s30 }
 0xae0   : > { %s2695_s26 = sshll.u32 %s4437_s1, 3 }
 0xae1   : > { %s4440_s8 = smov %s4439_s2  ;;  %s2051_s3 = scalar_lea.hbm %s4439_s2, %s2695_s26 }
 0xae2   : > { %s2055_s16 = sshll.u32 %s2051_s3, 4  ;;  %s3412_s22 = scalar_lea.hbm %s4440_s8, 16  ;;  %s2056_s16 = int_to_ptr.hbm [resolvable:$true] %s2055_s16 }
 0xae3   : > { %s3406_s5 = sshra.s32 %s2056_s16, 4  ;;  %s3407_s5 = int_to_ptr.hbm [resolvable:$true] %s3406_s5 }
 0xae4   : > { %s3408_s10 = scalar_lea.hbm %s3407_s5, 8  ;;  %p3413_p11 = scmp.lt.s32.totalorder %s3407_s5, %s4440_s8 }
 0xae5   : > { %p3409_p12 = scmp.ne.s32.totalorder %s3407_s5, %s3408_s10  ;;  %p3414_p8 = scmp.lt.s32.totalorder %s3412_s22, %s3408_s10 }
 0xae7   : > { %p3410_p2 = pnand %p3409_p12, %p3815_p0  ;;  %p3415_p13 = por %p3414_p8, %p3413_p11 }
 0xae9   : > { %p3411_p6 = pneg %p3410_p2 }
 0xaeb   : > { %p3416_p7 = pnand %p3415_p13, %p3411_p6 }
 0xaed   : > { %3419 = shalt.err (!%p3416_p7)
}
 0xaee   : > { %2807 = dma.vmem_to_hbm [thread:$0]  (%p3815_p0), %s2054_s14, 128, %s2056_s16, %s2041_s4  }
 0xaef PF: > { %s4442_s25 = sld [smem:[#allocation43_spill]] }
 0xaf0   : > { %s4443_s7 = sld [smem:[#allocation37_spill]] }
 0xaf5   : > { %p2863_p10 = scmp.ge.s32.totalorder %s4442_s25, 2 }
 0xaf6   : > { %s2067_s12 = sand.u32 1, %s4443_s7  }
 0xaf7   : > { %p2851_p5 = pnand %p2863_p10, %p3823_p4  ;;  %s2068_s20 = scalar_lea.sflag [#allocation5], %s2067_s12 }
 0xaf9   : > { %p2852_p1 = pneg %p2851_p5 }
 0xafb   : > { %3513 = dma.done.wait (%p2852_p1), %s2068_s20, 128  }
 0xafc   : > { %3515 = vsyncadd (%p2852_p1), %s2068_s20, 4294967168  ;;  %s39_s2 = sadd.s32 1, %s4442_s25   ;;  %s4445_s27 = sld [smem:[#allocation35_spill]] }
 0xafd   : > { %p36_p3 = scmp.ge.s32.totalorder %s39_s2, 6   ;;  %s4446_s28 = sld [smem:[#allocation36_spill]] }
 0xafe   : > { %s4447_s29 = sld [smem:[#allocation49_spill]]  ;;  %s4454_s30 = smov %s3534_s0 }
 0xaff   : > { %s4448_s17 = sld [smem:[#allocation38_spill]] }
 0xb00   : > { %s4449_s19 = sld [smem:[#allocation50_spill]] }
 0xb01   : > { %s4450_s1 = sld [smem:[#allocation41_spill]]  ;;  %38 = sbr.rel (!%p36_p3) target bundleno = 33 (0x21), region = 266 }
 0xb02   : > { %s4451_s20 = sld [smem:[#allocation42_spill]] }
 0xb03   : > { %s4452_s21 = sld [smem:[#allocation46_spill]] }
 0xb04   : > { %s4453_s22 = sld [smem:[#allocation48_spill]] }
 0xb05   : > { %s4455_s0 = smov %s4448_s17 }
 0xb06   :  { %2074 = vsyncpa [#allocation4], 1 }
 0xb07   :  { %2076 = vsyncpa [#allocation4 + $0x1], 1 }
 0xb08   :  { %2077 = vsyncpa [#allocation7], 1 }
 0xb09   :  { %2079 = vsyncpa [#allocation7 + $0x1], 1 }
 0xb0a   :  { %2080 = vsyncpa [#allocation10], 1 }
 0xb0b   :  { %2081 = vsyncpa [#allocation13], 1 }
 0xb0c   :  { %2082 = vsyncpa [#allocation5], 1 }
 0xb0d   :  { %2084 = vsyncpa [#allocation5 + $0x1], 1 }

</bundles_post_ra>
